<compile_context>
chip_gen: v7x
topology: tpu7x:2x2x1
jax: 0.10.0
libtpu: 0.0.40
codegen_flags: <defaults>
</compile_context>

<pallas_src>
import jax
import jax.numpy as jnp
import numpy as np
from jax.experimental import pallas as pl
from jax.experimental.pallas import tpu as pltpu

# ----------------------------------------------------------------------------
# Model dimensions
# ----------------------------------------------------------------------------
C_IN, C1, C2, NUM_CLASSES = 4, 8, 8, 10
H = W = 16
KH = KW = 3
HP = H + 2                 # per-image rows in the padded slab
NC_PAD = 16                # class dim padded for a cleaner bias/output tile
BATCH = 2
PRUNE_PERC = 30.0          # args.prune_perc


# ----------------------------------------------------------------------------
# Fused forward kernel: ONE grid step for the whole batch.
#   x_ref    : [N*HP, W*C_IN]  bf16, per-image rows 0 / H+1 are zero pad rows
#   conv     : acc[r, :] = sum_{i=0..2} window_i[r, :] @ Wband_i
#              window_i = slab[i : i + N*HP-2, :]   (sublane shift only)
#   rows b*HP .. b*HP+H-1 of acc are image b; rows 16,17 (boundary) are junk
#   and are simply never read.
#   fc       : logits[b, k] = sum_{h,(w,c)} h2_b[h, w*C2+c] * Wfc[k, h, w*C2+c]
# ----------------------------------------------------------------------------
def _fused_forward_kernel(x_ref, w1_ref, b1_ref, w2_ref, b2_ref, wfc_ref,
                          bfc_ref, o_ref, h1pad_ref):
    nrows = x_ref.shape[0]          # N * HP   (static)
    n = nrows // HP
    mrows = nrows - 2               # valid rows + per-boundary junk rows

    # ---- conv1: 3 band matmuls (bf16 MXU, f32 accumulation) ------------------
    acc1 = jnp.zeros((mrows, W * C1), jnp.float32)
    for i in range(KH):
        acc1 = acc1 + jnp.dot(x_ref[i:i + mrows, :], w1_ref[i],
                              preferred_element_type=jnp.float32)
    h1 = jnp.maximum(acc1 + b1_ref[...], 0.0)                    # [mrows, 128] f32

    # ---- conv2 input slab: zero ONLY the 2 pad rows per image, copy interiors
    for b in range(n):
        base = b * HP
        h1pad_ref[base:base + 1, :] = jnp.zeros((1, W * C1), jnp.float32)
        h1pad_ref[base + H + 1:base + H + 2, :] = jnp.zeros((1, W * C1),
                                                            jnp.float32)
        h1pad_ref[base + 1:base + 1 + H, :] = h1[base:base + H, :]

    # ---- conv2: 3 band matmuls ------------------------------------------------
    acc2 = jnp.zeros((mrows, W * C2), jnp.float32)
    for i in range(KH):
        acc2 = acc2 + jnp.dot(h1pad_ref[i:i + mrows, :].astype(jnp.bfloat16),
                              w2_ref[i], preferred_element_type=jnp.float32)
    h2 = jnp.maximum(acc2 + b2_ref[...], 0.0)                    # [mrows, 128] f32

    # ---- classifier: per-class multiply + reduce (no [10,16,128] temporary) --
    for b in range(n):
        h2_b = h2[b * HP:b * HP + H, :]                          # [16, 128]
        parts = [jnp.sum(wfc_ref[k] * h2_b, axis=0, keepdims=True)
                 for k in range(NUM_CLASSES)]                    # 10 x [1, 128]
        parts.append(jnp.zeros((NC_PAD - NUM_CLASSES, W * C2), jnp.float32))
        pm = jnp.concatenate(parts, axis=0)                      # [16, 128]
        logits = jnp.sum(pm, axis=1)                             # [16]
        o_ref[b:b + 1, :] = (logits[None, :] + bfc_ref[...]).astype(o_ref.dtype)


# ----------------------------------------------------------------------------
# ContinualModel.forward(x) -> self.net(x)
# ----------------------------------------------------------------------------
@jax.jit
def continual_model_forward(params, x_nchw: jax.Array) -> jax.Array:
    n = x_nchw.shape[0]
    nrows = n * HP
    # NCHW -> lane-dense, row-padded slab [N*HP, W*C_IN] in bf16 (done once
    # on the host; no in-kernel scratch / shifted stores for conv1's input).
    x_nhwc = jnp.transpose(x_nchw, (0, 2, 3, 1)).reshape(n, H, W * C_IN)
    xpad = jnp.pad(x_nhwc, ((0, 0), (1, 1), (0, 0)))
    xpad = xpad.reshape(nrows, W * C_IN).astype(jnp.bfloat16)

    out = pl.pallas_call(
        _fused_forward_kernel,
        out_shape=jax.ShapeDtypeStruct((n, NC_PAD), jnp.float32),
        grid=(1,),
        in_specs=[
            pl.BlockSpec((nrows, W * C_IN), lambda i: (0, 0)),            # x slab
            pl.BlockSpec((KH, W * C_IN, W * C1), lambda i: (0, 0, 0)),    # w1 band
            pl.BlockSpec((1, W * C1), lambda i: (0, 0)),                  # b1 row
            pl.BlockSpec((KH, W * C1, W * C2), lambda i: (0, 0, 0)),      # w2 band
            pl.BlockSpec((1, W * C2), lambda i: (0, 0)),                  # b2 row
            pl.BlockSpec((NUM_CLASSES, H, W * C2), lambda i: (0, 0, 0)),  # fc weight
            pl.BlockSpec((1, NC_PAD), lambda i: (0, 0)),                  # fc bias
        ],
        out_specs=pl.BlockSpec((n, NC_PAD), lambda i: (0, 0)),
        scratch_shapes=[pltpu.VMEM((nrows, W * C1), jnp.float32)],        # conv2 slab
        compiler_params=pltpu.CompilerParams(
            dimension_semantics=("arbitrary",)),
    )(xpad, params["w1band"], params["b1row"], params["w2band"],
      params["b2row"], params["wfc3"], params["bfc"])
    return out[:, :NUM_CLASSES]


# ----------------------------------------------------------------------------
# Parameters + random_prune masks + one-time repack to kernel layouts.
# ----------------------------------------------------------------------------
def init_params_and_masks():
    key = jax.random.PRNGKey(0)
    k = jax.random.split(key, 6)
    w_c1 = np.asarray(jax.random.normal(k[0], (C1, C_IN, KH, KW), jnp.float32)) * 0.1
    b_c1 = np.asarray(jax.random.normal(k[1], (C1,), jnp.float32)) * 0.1
    w_c2 = np.asarray(jax.random.normal(k[2], (C2, C1, KH, KW), jnp.float32)) * 0.1
    b_c2 = np.asarray(jax.random.normal(k[3], (C2,), jnp.float32)) * 0.1
    w_fc = np.asarray(jax.random.normal(k[4], (NUM_CLASSES, C2 * H * W), jnp.float32)) * 0.02
    b_fc = np.asarray(jax.random.normal(k[5], (NUM_CLASSES,), jnp.float32)) * 0.02

    # random_prune(model, prune_perc, skip_first=True): masks baked into weights.
    rng = np.random.RandomState(0)
    p = PRUNE_PERC / 100.0
    conn1 = np.ones((C1, C_IN), dtype=np.float32)                 # first conv: skip
    conn2 = rng.choice([0, 1], (C2, C1), p=[p, 1 - p]).astype(np.float32)
    mask_fc = rng.choice([0, 1], (NUM_CLASSES, C2 * H * W),
                         p=[p, 1 - p]).astype(np.float32)
    w_c1m = (w_c1 * conn1[:, :, None, None]).astype(np.float32)
    w_c2m = (w_c2 * conn2[:, :, None, None]).astype(np.float32)
    w_fcm = (w_fc * mask_fc).astype(np.float32)
    # bias masks are all ones -> biases unchanged

    masked = dict(w_c1=w_c1m, b_c1=b_c1, w_c2=w_c2m, b_c2=b_c2,
                  w_fc=w_fcm, b_fc=b_fc)

    # ---- one-time host-side repack into kernel-friendly layouts --------------
    def conv_to_band(wt, cin, cout):
        """[cout, cin, 3, 3] -> [3, W*cin, W*cout] band matrices (j taps folded).

        band[i][w_in*cin + ci, w_out*cout + co] = wt[co, ci, i, w_in - w_out + 1]
        for |w_in - w_out| <= 1, else 0 (boundary taps fall off the band, which
        exactly reproduces zero padding along w).
        """
        band = np.zeros((KH, W * cin, W * cout), np.float32)
        for i in range(KH):
            for w_out in range(W):
                for j in range(KW):
                    w_in = w_out + j - 1
                    if 0 <= w_in < W:
                        band[i,
                             w_in * cin:(w_in + 1) * cin,
                             w_out * cout:(w_out + 1) * cout] = wt[:, :, i, j].T
        return band

    # fc weight: columns follow torch NCHW flatten; repack to [10, H, W*C2]
    # so wfc3[k, h, w*C2 + c] == w_fc[k, c*H*W + h*W + w]  (exact equivalence).
    wfc4 = w_fcm.reshape(NUM_CLASSES, C2, H, W)
    wfc3 = np.transpose(wfc4, (0, 2, 3, 1)).reshape(NUM_CLASSES, H, W * C2)

    bfc_pad = np.zeros((1, NC_PAD), np.float32)
    bfc_pad[0, :NUM_CLASSES] = b_fc

    params = {
        "w1band": jnp.asarray(conv_to_band(w_c1m, C_IN, C1), jnp.bfloat16),  # [3, 64, 128]
        "b1row": jnp.asarray(np.tile(b_c1, W)[None, :]),                     # [1, 128] f32
        "w2band": jnp.asarray(conv_to_band(w_c2m, C1, C2), jnp.bfloat16),    # [3, 128, 128]
        "b2row": jnp.asarray(np.tile(b_c2, W)[None, :]),                     # [1, 128] f32
        "wfc3": jnp.asarray(wfc3, jnp.bfloat16),                             # [10, 16, 128]
        "bfc": jnp.asarray(bfc_pad),                                         # [1, 16] f32
    }
    return params, masked


# ----------------------------------------------------------------------------
# Pure numpy reference (torch semantics) for a correctness check.
# ----------------------------------------------------------------------------
def _reference_forward_np(m, x_nchw):
    x = np.asarray(x_nchw, np.float64)

    def conv_relu(xin, wt, b):
        nn, _, hh, ww = xin.shape
        xp = np.pad(xin, ((0, 0), (0, 0), (1, 1), (1, 1)))
        out = np.zeros((nn, wt.shape[0], hh, ww), np.float64)
        for i in range(KH):
            for j in range(KW):
                out += np.einsum('nchw,kc->nkhw',
                                 xp[:, :, i:i + hh, j:j + ww],
                                 wt[:, :, i, j].astype(np.float64))
        out += b[None, :, None, None]
        return np.maximum(out, 0.0)

    h = conv_relu(x, m["w_c1"], m["b_c1"])
    h = conv_relu(h, m["w_c2"], m["b_c2"])
    flat = h.reshape(x.shape[0], -1)                      # NCHW flatten (torch)
    return flat @ m["w_fc"].T.astype(np.float64) + m["b_fc"][None, :]


if __name__ == "__main__":
    params, masked = init_params_and_masks()
    x = jax.random.normal(jax.random.PRNGKey(0), (BATCH, C_IN, H, W), jnp.float32)
    out = continual_model_forward(params, x)
    out = jax.block_until_ready(out)
    assert out.shape == (BATCH, NUM_CLASSES) and out.dtype == jnp.float32
    ref = _reference_forward_np(masked, np.asarray(x))
    # bf16 MXU operands (weights + activations) vs a float64 reference:
    # observed error is a few 1e-3; 2e-2 keeps margin while still catching
    # any layout / indexing bug (those produce O(0.1-1) errors).
    np.testing.assert_allclose(np.asarray(out), ref, rtol=2e-2, atol=2e-2)
    print("KERNEL_OK")
</pallas_src>

<mosaic_0001>
module attributes {stable_mosaic.version = 11 : i64} {
  func.func @_fused_forward_kernel(%arg0: i32, %arg1: memref<36x64xbf16, #tpu.memory_space<vmem>>, %arg2: memref<3x64x128xbf16, #tpu.memory_space<vmem>>, %arg3: memref<1x128xf32, #tpu.memory_space<vmem>>, %arg4: memref<3x128x128xbf16, #tpu.memory_space<vmem>>, %arg5: memref<1x128xf32, #tpu.memory_space<vmem>>, %arg6: memref<10x16x128xbf16, #tpu.memory_space<vmem>>, %arg7: memref<1x16xf32, #tpu.memory_space<vmem>>, %arg8: memref<2x16xf32, #tpu.memory_space<vmem>>, %arg9: memref<36x128xf32, #tpu.memory_space<vmem>>) attributes {dimension_semantics = [#tpu.dimension_semantics<arbitrary>], iteration_bounds = array<i64: 1>, scalar_prefetch = 0 : i64, scratch_operands = 1 : i64, tpu.core_type = #tpu.core_type<tc>, window_params = [{pipeline_mode = #tpu.pipeline_mode<synchronous>, transform_indices = @transform_0, window_bounds = array<i64: 36, 64>}, {pipeline_mode = #tpu.pipeline_mode<synchronous>, transform_indices = @transform_1, window_bounds = array<i64: 3, 64, 128>}, {pipeline_mode = #tpu.pipeline_mode<synchronous>, transform_indices = @transform_2, window_bounds = array<i64: 1, 128>}, {pipeline_mode = #tpu.pipeline_mode<synchronous>, transform_indices = @transform_3, window_bounds = array<i64: 3, 128, 128>}, {pipeline_mode = #tpu.pipeline_mode<synchronous>, transform_indices = @transform_4, window_bounds = array<i64: 1, 128>}, {pipeline_mode = #tpu.pipeline_mode<synchronous>, transform_indices = @transform_5, window_bounds = array<i64: 10, 16, 128>}, {pipeline_mode = #tpu.pipeline_mode<synchronous>, transform_indices = @transform_6, window_bounds = array<i64: 1, 16>}, {pipeline_mode = #tpu.pipeline_mode<synchronous>, transform_indices = @transform_7, window_bounds = array<i64: 2, 16>}]} {
    %cst = arith.constant 0.000000e+00 : f32
    %0 = vector.broadcast %cst : f32 to vector<34x128xf32>
    %c0 = arith.constant 0 : index
    %c0_0 = arith.constant 0 : index
    %1 = vector.load %arg1[%c0, %c0_0] : memref<36x64xbf16, #tpu.memory_space<vmem>>, vector<34x64xbf16>
    %c0_1 = arith.constant 0 : index
    %c0_2 = arith.constant 0 : index
    %c0_3 = arith.constant 0 : index
    %2 = vector.load %arg2[%c0_1, %c0_2, %c0_3] : memref<3x64x128xbf16, #tpu.memory_space<vmem>>, vector<1x64x128xbf16>
    %3 = vector.shape_cast %2 : vector<1x64x128xbf16> to vector<64x128xbf16>
    %cst_4 = arith.constant dense<0.000000e+00> : vector<34x128xf32>
    %4 = tpu.matmul %1, %3, %cst_4 {dimension_numbers = #tpu.dot_dimension_numbers<[1], [0], [0], [1], [0, 0, 1, 1], [], []>} : vector<34x64xbf16>, vector<64x128xbf16>, vector<34x128xf32> -> vector<34x128xf32>
    %5 = arith.addf %0, %4 : vector<34x128xf32>
    %c1 = arith.constant 1 : index
    %c0_5 = arith.constant 0 : index
    %6 = vector.load %arg1[%c1, %c0_5] : memref<36x64xbf16, #tpu.memory_space<vmem>>, vector<34x64xbf16>
    %c1_6 = arith.constant 1 : index
    %c0_7 = arith.constant 0 : index
    %c0_8 = arith.constant 0 : index
    %7 = vector.load %arg2[%c1_6, %c0_7, %c0_8] : memref<3x64x128xbf16, #tpu.memory_space<vmem>>, vector<1x64x128xbf16>
    %8 = vector.shape_cast %7 : vector<1x64x128xbf16> to vector<64x128xbf16>
    %cst_9 = arith.constant dense<0.000000e+00> : vector<34x128xf32>
    %9 = tpu.matmul %6, %8, %cst_9 {dimension_numbers = #tpu.dot_dimension_numbers<[1], [0], [0], [1], [0, 0, 1, 1], [], []>} : vector<34x64xbf16>, vector<64x128xbf16>, vector<34x128xf32> -> vector<34x128xf32>
    %10 = arith.addf %5, %9 : vector<34x128xf32>
    %c2 = arith.constant 2 : index
    %c0_10 = arith.constant 0 : index
    %11 = vector.load %arg1[%c2, %c0_10] : memref<36x64xbf16, #tpu.memory_space<vmem>>, vector<34x64xbf16>
    %c2_11 = arith.constant 2 : index
    %c0_12 = arith.constant 0 : index
    %c0_13 = arith.constant 0 : index
    %12 = vector.load %arg2[%c2_11, %c0_12, %c0_13] : memref<3x64x128xbf16, #tpu.memory_space<vmem>>, vector<1x64x128xbf16>
    %13 = vector.shape_cast %12 : vector<1x64x128xbf16> to vector<64x128xbf16>
    %cst_14 = arith.constant dense<0.000000e+00> : vector<34x128xf32>
    %14 = tpu.matmul %11, %13, %cst_14 {dimension_numbers = #tpu.dot_dimension_numbers<[1], [0], [0], [1], [0, 0, 1, 1], [], []>} : vector<34x64xbf16>, vector<64x128xbf16>, vector<34x128xf32> -> vector<34x128xf32>
    %15 = arith.addf %10, %14 : vector<34x128xf32>
    %c0_15 = arith.constant 0 : index
    %c0_16 = arith.constant 0 : index
    %16 = vector.load %arg3[%c0_15, %c0_16] : memref<1x128xf32, #tpu.memory_space<vmem>>, vector<1x128xf32>
    %17 = vector.broadcast %16 : vector<1x128xf32> to vector<34x128xf32>
    %18 = arith.addf %15, %17 : vector<34x128xf32>
    %cst_17 = arith.constant 0.000000e+00 : f32
    %19 = vector.broadcast %cst_17 : f32 to vector<34x128xf32>
    %20 = arith.maximumf %18, %19 : vector<34x128xf32>
    %cst_18 = arith.constant 0.000000e+00 : f32
    %21 = vector.broadcast %cst_18 : f32 to vector<1x128xf32>
    %c0_19 = arith.constant 0 : index
    %c0_20 = arith.constant 0 : index
    %22 = vector.load %arg9[%c0_19, %c0_20] : memref<36x128xf32, #tpu.memory_space<vmem>>, vector<1x128xf32>
    tpu.vector_store %arg9[%c0_19, %c0_20], %21 {strides = array<i32>} : memref<36x128xf32, #tpu.memory_space<vmem>>, vector<1x128xf32>,
    %cst_21 = arith.constant 0.000000e+00 : f32
    %23 = vector.broadcast %cst_21 : f32 to vector<1x128xf32>
    %c17 = arith.constant 17 : index
    %c0_22 = arith.constant 0 : index
    %24 = vector.load %arg9[%c17, %c0_22] : memref<36x128xf32, #tpu.memory_space<vmem>>, vector<1x128xf32>
    tpu.vector_store %arg9[%c17, %c0_22], %23 {strides = array<i32>} : memref<36x128xf32, #tpu.memory_space<vmem>>, vector<1x128xf32>,
    %25 = vector.extract_strided_slice %20 {offsets = [0, 0], sizes = [16, 128], strides = [1, 1]} : vector<34x128xf32> to vector<16x128xf32>
    %c1_23 = arith.constant 1 : index
    %c0_24 = arith.constant 0 : index
    %26 = vector.load %arg9[%c1_23, %c0_24] : memref<36x128xf32, #tpu.memory_space<vmem>>, vector<16x128xf32>
    tpu.vector_store %arg9[%c1_23, %c0_24], %25 {strides = array<i32>} : memref<36x128xf32, #tpu.memory_space<vmem>>, vector<16x128xf32>,
    %cst_25 = arith.constant 0.000000e+00 : f32
    %27 = vector.broadcast %cst_25 : f32 to vector<1x128xf32>
    %c18 = arith.constant 18 : index
    %c0_26 = arith.constant 0 : index
    %28 = vector.load %arg9[%c18, %c0_26] : memref<36x128xf32, #tpu.memory_space<vmem>>, vector<1x128xf32>
    tpu.vector_store %arg9[%c18, %c0_26], %27 {strides = array<i32>} : memref<36x128xf32, #tpu.memory_space<vmem>>, vector<1x128xf32>,
    %cst_27 = arith.constant 0.000000e+00 : f32
    %29 = vector.broadcast %cst_27 : f32 to vector<1x128xf32>
    %c35 = arith.constant 35 : index
    %c0_28 = arith.constant 0 : index
    %30 = vector.load %arg9[%c35, %c0_28] : memref<36x128xf32, #tpu.memory_space<vmem>>, vector<1x128xf32>
    tpu.vector_store %arg9[%c35, %c0_28], %29 {strides = array<i32>} : memref<36x128xf32, #tpu.memory_space<vmem>>, vector<1x128xf32>,
    %31 = vector.extract_strided_slice %20 {offsets = [18, 0], sizes = [16, 128], strides = [1, 1]} : vector<34x128xf32> to vector<16x128xf32>
    %c19 = arith.constant 19 : index
    %c0_29 = arith.constant 0 : index
    %32 = vector.load %arg9[%c19, %c0_29] : memref<36x128xf32, #tpu.memory_space<vmem>>, vector<16x128xf32>
    tpu.vector_store %arg9[%c19, %c0_29], %31 {strides = array<i32>} : memref<36x128xf32, #tpu.memory_space<vmem>>, vector<16x128xf32>,
    %cst_30 = arith.constant 0.000000e+00 : f32
    %33 = vector.broadcast %cst_30 : f32 to vector<34x128xf32>
    %c0_31 = arith.constant 0 : index
    %c0_32 = arith.constant 0 : index
    %34 = vector.load %arg9[%c0_31, %c0_32] : memref<36x128xf32, #tpu.memory_space<vmem>>, vector<34x128xf32>
    %35 = arith.truncf %34 : vector<34x128xf32> to vector<34x128xbf16>
    %c0_33 = arith.constant 0 : index
    %c0_34 = arith.constant 0 : index
    %c0_35 = arith.constant 0 : index
    %36 = vector.load %arg4[%c0_33, %c0_34, %c0_35] : memref<3x128x128xbf16, #tpu.memory_space<vmem>>, vector<1x128x128xbf16>
    %37 = vector.shape_cast %36 : vector<1x128x128xbf16> to vector<128x128xbf16>
    %cst_36 = arith.constant dense<0.000000e+00> : vector<34x128xf32>
    %38 = tpu.matmul %35, %37, %cst_36 {dimension_numbers = #tpu.dot_dimension_numbers<[1], [0], [0], [1], [0, 0, 1, 1], [], []>} : vector<34x128xbf16>, vector<128x128xbf16>, vector<34x128xf32> -> vector<34x128xf32>
    %39 = arith.addf %33, %38 : vector<34x128xf32>
    %c1_37 = arith.constant 1 : index
    %c0_38 = arith.constant 0 : index
    %40 = vector.load %arg9[%c1_37, %c0_38] : memref<36x128xf32, #tpu.memory_space<vmem>>, vector<34x128xf32>
    %41 = arith.truncf %40 : vector<34x128xf32> to vector<34x128xbf16>
    %c1_39 = arith.constant 1 : index
    %c0_40 = arith.constant 0 : index
    %c0_41 = arith.constant 0 : index
    %42 = vector.load %arg4[%c1_39, %c0_40, %c0_41] : memref<3x128x128xbf16, #tpu.memory_space<vmem>>, vector<1x128x128xbf16>
    %43 = vector.shape_cast %42 : vector<1x128x128xbf16> to vector<128x128xbf16>
    %cst_42 = arith.constant dense<0.000000e+00> : vector<34x128xf32>
    %44 = tpu.matmul %41, %43, %cst_42 {dimension_numbers = #tpu.dot_dimension_numbers<[1], [0], [0], [1], [0, 0, 1, 1], [], []>} : vector<34x128xbf16>, vector<128x128xbf16>, vector<34x128xf32> -> vector<34x128xf32>
    %45 = arith.addf %39, %44 : vector<34x128xf32>
    %c2_43 = arith.constant 2 : index
    %c0_44 = arith.constant 0 : index
    %46 = vector.load %arg9[%c2_43, %c0_44] : memref<36x128xf32, #tpu.memory_space<vmem>>, vector<34x128xf32>
    %47 = arith.truncf %46 : vector<34x128xf32> to vector<34x128xbf16>
    %c2_45 = arith.constant 2 : index
    %c0_46 = arith.constant 0 : index
    %c0_47 = arith.constant 0 : index
    %48 = vector.load %arg4[%c2_45, %c0_46, %c0_47] : memref<3x128x128xbf16, #tpu.memory_space<vmem>>, vector<1x128x128xbf16>
    %49 = vector.shape_cast %48 : vector<1x128x128xbf16> to vector<128x128xbf16>
    %cst_48 = arith.constant dense<0.000000e+00> : vector<34x128xf32>
    %50 = tpu.matmul %47, %49, %cst_48 {dimension_numbers = #tpu.dot_dimension_numbers<[1], [0], [0], [1], [0, 0, 1, 1], [], []>} : vector<34x128xbf16>, vector<128x128xbf16>, vector<34x128xf32> -> vector<34x128xf32>
    %51 = arith.addf %45, %50 : vector<34x128xf32>
    %c0_49 = arith.constant 0 : index
    %c0_50 = arith.constant 0 : index
    %52 = vector.load %arg5[%c0_49, %c0_50] : memref<1x128xf32, #tpu.memory_space<vmem>>, vector<1x128xf32>
    %53 = vector.broadcast %52 : vector<1x128xf32> to vector<34x128xf32>
    %54 = arith.addf %51, %53 : vector<34x128xf32>
    %cst_51 = arith.constant 0.000000e+00 : f32
    %55 = vector.broadcast %cst_51 : f32 to vector<34x128xf32>
    %56 = arith.maximumf %54, %55 : vector<34x128xf32>
    %57 = vector.extract_strided_slice %56 {offsets = [0, 0], sizes = [16, 128], strides = [1, 1]} : vector<34x128xf32> to vector<16x128xf32>
    %c0_52 = arith.constant 0 : index
    %c0_53 = arith.constant 0 : index
    %c0_54 = arith.constant 0 : index
    %58 = vector.load %arg6[%c0_52, %c0_53, %c0_54] : memref<10x16x128xbf16, #tpu.memory_space<vmem>>, vector<1x16x128xbf16>
    %59 = vector.shape_cast %58 : vector<1x16x128xbf16> to vector<16x128xbf16>
    %60 = arith.extf %59 : vector<16x128xbf16> to vector<16x128xf32>
    %61 = arith.mulf %60, %57 : vector<16x128xf32>
    %cst_55 = arith.constant dense<0.000000e+00> : vector<128xf32>
    %62 = vector.multi_reduction <add>, %61, %cst_55 [0] : vector<16x128xf32> to vector<128xf32>
    %63 = vector.shape_cast %62 : vector<128xf32> to vector<1x128xf32>
    %c1_56 = arith.constant 1 : index
    %c0_57 = arith.constant 0 : index
    %c0_58 = arith.constant 0 : index
    %64 = vector.load %arg6[%c1_56, %c0_57, %c0_58] : memref<10x16x128xbf16, #tpu.memory_space<vmem>>, vector<1x16x128xbf16>
    %65 = vector.shape_cast %64 : vector<1x16x128xbf16> to vector<16x128xbf16>
    %66 = arith.extf %65 : vector<16x128xbf16> to vector<16x128xf32>
    %67 = arith.mulf %66, %57 : vector<16x128xf32>
    %cst_59 = arith.constant dense<0.000000e+00> : vector<128xf32>
    %68 = vector.multi_reduction <add>, %67, %cst_59 [0] : vector<16x128xf32> to vector<128xf32>
    %69 = vector.shape_cast %68 : vector<128xf32> to vector<1x128xf32>
    %c2_60 = arith.constant 2 : index
    %c0_61 = arith.constant 0 : index
    %c0_62 = arith.constant 0 : index
    %70 = vector.load %arg6[%c2_60, %c0_61, %c0_62] : memref<10x16x128xbf16, #tpu.memory_space<vmem>>, vector<1x16x128xbf16>
    %71 = vector.shape_cast %70 : vector<1x16x128xbf16> to vector<16x128xbf16>
    %72 = arith.extf %71 : vector<16x128xbf16> to vector<16x128xf32>
    %73 = arith.mulf %72, %57 : vector<16x128xf32>
    %cst_63 = arith.constant dense<0.000000e+00> : vector<128xf32>
    %74 = vector.multi_reduction <add>, %73, %cst_63 [0] : vector<16x128xf32> to vector<128xf32>
    %75 = vector.shape_cast %74 : vector<128xf32> to vector<1x128xf32>
    %c3 = arith.constant 3 : index
    %c0_64 = arith.constant 0 : index
    %c0_65 = arith.constant 0 : index
    %76 = vector.load %arg6[%c3, %c0_64, %c0_65] : memref<10x16x128xbf16, #tpu.memory_space<vmem>>, vector<1x16x128xbf16>
    %77 = vector.shape_cast %76 : vector<1x16x128xbf16> to vector<16x128xbf16>
    %78 = arith.extf %77 : vector<16x128xbf16> to vector<16x128xf32>
    %79 = arith.mulf %78, %57 : vector<16x128xf32>
    %cst_66 = arith.constant dense<0.000000e+00> : vector<128xf32>
    %80 = vector.multi_reduction <add>, %79, %cst_66 [0] : vector<16x128xf32> to vector<128xf32>
    %81 = vector.shape_cast %80 : vector<128xf32> to vector<1x128xf32>
    %c4 = arith.constant 4 : index
    %c0_67 = arith.constant 0 : index
    %c0_68 = arith.constant 0 : index
    %82 = vector.load %arg6[%c4, %c0_67, %c0_68] : memref<10x16x128xbf16, #tpu.memory_space<vmem>>, vector<1x16x128xbf16>
    %83 = vector.shape_cast %82 : vector<1x16x128xbf16> to vector<16x128xbf16>
    %84 = arith.extf %83 : vector<16x128xbf16> to vector<16x128xf32>
    %85 = arith.mulf %84, %57 : vector<16x128xf32>
    %cst_69 = arith.constant dense<0.000000e+00> : vector<128xf32>
    %86 = vector.multi_reduction <add>, %85, %cst_69 [0] : vector<16x128xf32> to vector<128xf32>
    %87 = vector.shape_cast %86 : vector<128xf32> to vector<1x128xf32>
    %c5 = arith.constant 5 : index
    %c0_70 = arith.constant 0 : index
    %c0_71 = arith.constant 0 : index
    %88 = vector.load %arg6[%c5, %c0_70, %c0_71] : memref<10x16x128xbf16, #tpu.memory_space<vmem>>, vector<1x16x128xbf16>
    %89 = vector.shape_cast %88 : vector<1x16x128xbf16> to vector<16x128xbf16>
    %90 = arith.extf %89 : vector<16x128xbf16> to vector<16x128xf32>
    %91 = arith.mulf %90, %57 : vector<16x128xf32>
    %cst_72 = arith.constant dense<0.000000e+00> : vector<128xf32>
    %92 = vector.multi_reduction <add>, %91, %cst_72 [0] : vector<16x128xf32> to vector<128xf32>
    %93 = vector.shape_cast %92 : vector<128xf32> to vector<1x128xf32>
    %c6 = arith.constant 6 : index
    %c0_73 = arith.constant 0 : index
    %c0_74 = arith.constant 0 : index
    %94 = vector.load %arg6[%c6, %c0_73, %c0_74] : memref<10x16x128xbf16, #tpu.memory_space<vmem>>, vector<1x16x128xbf16>
    %95 = vector.shape_cast %94 : vector<1x16x128xbf16> to vector<16x128xbf16>
    %96 = arith.extf %95 : vector<16x128xbf16> to vector<16x128xf32>
    %97 = arith.mulf %96, %57 : vector<16x128xf32>
    %cst_75 = arith.constant dense<0.000000e+00> : vector<128xf32>
    %98 = vector.multi_reduction <add>, %97, %cst_75 [0] : vector<16x128xf32> to vector<128xf32>
    %99 = vector.shape_cast %98 : vector<128xf32> to vector<1x128xf32>
    %c7 = arith.constant 7 : index
    %c0_76 = arith.constant 0 : index
    %c0_77 = arith.constant 0 : index
    %100 = vector.load %arg6[%c7, %c0_76, %c0_77] : memref<10x16x128xbf16, #tpu.memory_space<vmem>>, vector<1x16x128xbf16>
    %101 = vector.shape_cast %100 : vector<1x16x128xbf16> to vector<16x128xbf16>
    %102 = arith.extf %101 : vector<16x128xbf16> to vector<16x128xf32>
    %103 = arith.mulf %102, %57 : vector<16x128xf32>
    %cst_78 = arith.constant dense<0.000000e+00> : vector<128xf32>
    %104 = vector.multi_reduction <add>, %103, %cst_78 [0] : vector<16x128xf32> to vector<128xf32>
    %105 = vector.shape_cast %104 : vector<128xf32> to vector<1x128xf32>
    %c8 = arith.constant 8 : index
    %c0_79 = arith.constant 0 : index
    %c0_80 = arith.constant 0 : index
    %106 = vector.load %arg6[%c8, %c0_79, %c0_80] : memref<10x16x128xbf16, #tpu.memory_space<vmem>>, vector<1x16x128xbf16>
    %107 = vector.shape_cast %106 : vector<1x16x128xbf16> to vector<16x128xbf16>
    %108 = arith.extf %107 : vector<16x128xbf16> to vector<16x128xf32>
    %109 = arith.mulf %108, %57 : vector<16x128xf32>
    %cst_81 = arith.constant dense<0.000000e+00> : vector<128xf32>
    %110 = vector.multi_reduction <add>, %109, %cst_81 [0] : vector<16x128xf32> to vector<128xf32>
    %111 = vector.shape_cast %110 : vector<128xf32> to vector<1x128xf32>
    %c9 = arith.constant 9 : index
    %c0_82 = arith.constant 0 : index
    %c0_83 = arith.constant 0 : index
    %112 = vector.load %arg6[%c9, %c0_82, %c0_83] : memref<10x16x128xbf16, #tpu.memory_space<vmem>>, vector<1x16x128xbf16>
    %113 = vector.shape_cast %112 : vector<1x16x128xbf16> to vector<16x128xbf16>
    %114 = arith.extf %113 : vector<16x128xbf16> to vector<16x128xf32>
    %115 = arith.mulf %114, %57 : vector<16x128xf32>
    %cst_84 = arith.constant dense<0.000000e+00> : vector<128xf32>
    %116 = vector.multi_reduction <add>, %115, %cst_84 [0] : vector<16x128xf32> to vector<128xf32>
    %117 = vector.shape_cast %116 : vector<128xf32> to vector<1x128xf32>
    %cst_85 = arith.constant 0.000000e+00 : f32
    %118 = vector.broadcast %cst_85 : f32 to vector<6x128xf32>
    %119 = tpu.concatenate %63, %69, %75, %81, %87, %93, %99, %105, %111, %117, %118 in 0 : vector<1x128xf32>, vector<1x128xf32>, vector<1x128xf32>, vector<1x128xf32>, vector<1x128xf32>, vector<1x128xf32>, vector<1x128xf32>, vector<1x128xf32>, vector<1x128xf32>, vector<1x128xf32>, vector<6x128xf32> -> vector<16x128xf32>
    %cst_86 = arith.constant dense<0.000000e+00> : vector<16xf32>
    %120 = vector.multi_reduction <add>, %119, %cst_86 [1] : vector<16x128xf32> to vector<16xf32>
    %121 = vector.shape_cast %120 : vector<16xf32> to vector<1x16xf32>
    %c0_87 = arith.constant 0 : index
    %c0_88 = arith.constant 0 : index
    %122 = vector.load %arg7[%c0_87, %c0_88] : memref<1x16xf32, #tpu.memory_space<vmem>>, vector<1x16xf32>
    %123 = arith.addf %121, %122 : vector<1x16xf32>
    %c0_89 = arith.constant 0 : index
    %c0_90 = arith.constant 0 : index
    %124 = vector.load %arg8[%c0_89, %c0_90] : memref<2x16xf32, #tpu.memory_space<vmem>>, vector<1x16xf32>
    tpu.vector_store %arg8[%c0_89, %c0_90], %123 {strides = array<i32>} : memref<2x16xf32, #tpu.memory_space<vmem>>, vector<1x16xf32>,
    %125 = vector.extract_strided_slice %56 {offsets = [18, 0], sizes = [16, 128], strides = [1, 1]} : vector<34x128xf32> to vector<16x128xf32>
    %c0_91 = arith.constant 0 : index
    %c0_92 = arith.constant 0 : index
    %c0_93 = arith.constant 0 : index
    %126 = vector.load %arg6[%c0_91, %c0_92, %c0_93] : memref<10x16x128xbf16, #tpu.memory_space<vmem>>, vector<1x16x128xbf16>
    %127 = vector.shape_cast %126 : vector<1x16x128xbf16> to vector<16x128xbf16>
    %128 = arith.extf %127 : vector<16x128xbf16> to vector<16x128xf32>
    %129 = arith.mulf %128, %125 : vector<16x128xf32>
    %cst_94 = arith.constant dense<0.000000e+00> : vector<128xf32>
    %130 = vector.multi_reduction <add>, %129, %cst_94 [0] : vector<16x128xf32> to vector<128xf32>
    %131 = vector.shape_cast %130 : vector<128xf32> to vector<1x128xf32>
    %c1_95 = arith.constant 1 : index
    %c0_96 = arith.constant 0 : index
    %c0_97 = arith.constant 0 : index
    %132 = vector.load %arg6[%c1_95, %c0_96, %c0_97] : memref<10x16x128xbf16, #tpu.memory_space<vmem>>, vector<1x16x128xbf16>
    %133 = vector.shape_cast %132 : vector<1x16x128xbf16> to vector<16x128xbf16>
    %134 = arith.extf %133 : vector<16x128xbf16> to vector<16x128xf32>
    %135 = arith.mulf %134, %125 : vector<16x128xf32>
    %cst_98 = arith.constant dense<0.000000e+00> : vector<128xf32>
    %136 = vector.multi_reduction <add>, %135, %cst_98 [0] : vector<16x128xf32> to vector<128xf32>
    %137 = vector.shape_cast %136 : vector<128xf32> to vector<1x128xf32>
    %c2_99 = arith.constant 2 : index
    %c0_100 = arith.constant 0 : index
    %c0_101 = arith.constant 0 : index
    %138 = vector.load %arg6[%c2_99, %c0_100, %c0_101] : memref<10x16x128xbf16, #tpu.memory_space<vmem>>, vector<1x16x128xbf16>
    %139 = vector.shape_cast %138 : vector<1x16x128xbf16> to vector<16x128xbf16>
    %140 = arith.extf %139 : vector<16x128xbf16> to vector<16x128xf32>
    %141 = arith.mulf %140, %125 : vector<16x128xf32>
    %cst_102 = arith.constant dense<0.000000e+00> : vector<128xf32>
    %142 = vector.multi_reduction <add>, %141, %cst_102 [0] : vector<16x128xf32> to vector<128xf32>
    %143 = vector.shape_cast %142 : vector<128xf32> to vector<1x128xf32>
    %c3_103 = arith.constant 3 : index
    %c0_104 = arith.constant 0 : index
    %c0_105 = arith.constant 0 : index
    %144 = vector.load %arg6[%c3_103, %c0_104, %c0_105] : memref<10x16x128xbf16, #tpu.memory_space<vmem>>, vector<1x16x128xbf16>
    %145 = vector.shape_cast %144 : vector<1x16x128xbf16> to vector<16x128xbf16>
    %146 = arith.extf %145 : vector<16x128xbf16> to vector<16x128xf32>
    %147 = arith.mulf %146, %125 : vector<16x128xf32>
    %cst_106 = arith.constant dense<0.000000e+00> : vector<128xf32>
    %148 = vector.multi_reduction <add>, %147, %cst_106 [0] : vector<16x128xf32> to vector<128xf32>
    %149 = vector.shape_cast %148 : vector<128xf32> to vector<1x128xf32>
    %c4_107 = arith.constant 4 : index
    %c0_108 = arith.constant 0 : index
    %c0_109 = arith.constant 0 : index
    %150 = vector.load %arg6[%c4_107, %c0_108, %c0_109] : memref<10x16x128xbf16, #tpu.memory_space<vmem>>, vector<1x16x128xbf16>
    %151 = vector.shape_cast %150 : vector<1x16x128xbf16> to vector<16x128xbf16>
    %152 = arith.extf %151 : vector<16x128xbf16> to vector<16x128xf32>
    %153 = arith.mulf %152, %125 : vector<16x128xf32>
    %cst_110 = arith.constant dense<0.000000e+00> : vector<128xf32>
    %154 = vector.multi_reduction <add>, %153, %cst_110 [0] : vector<16x128xf32> to vector<128xf32>
    %155 = vector.shape_cast %154 : vector<128xf32> to vector<1x128xf32>
    %c5_111 = arith.constant 5 : index
    %c0_112 = arith.constant 0 : index
    %c0_113 = arith.constant 0 : index
    %156 = vector.load %arg6[%c5_111, %c0_112, %c0_113] : memref<10x16x128xbf16, #tpu.memory_space<vmem>>, vector<1x16x128xbf16>
    %157 = vector.shape_cast %156 : vector<1x16x128xbf16> to vector<16x128xbf16>
    %158 = arith.extf %157 : vector<16x128xbf16> to vector<16x128xf32>
    %159 = arith.mulf %158, %125 : vector<16x128xf32>
    %cst_114 = arith.constant dense<0.000000e+00> : vector<128xf32>
    %160 = vector.multi_reduction <add>, %159, %cst_114 [0] : vector<16x128xf32> to vector<128xf32>
    %161 = vector.shape_cast %160 : vector<128xf32> to vector<1x128xf32>
    %c6_115 = arith.constant 6 : index
    %c0_116 = arith.constant 0 : index
    %c0_117 = arith.constant 0 : index
    %162 = vector.load %arg6[%c6_115, %c0_116, %c0_117] : memref<10x16x128xbf16, #tpu.memory_space<vmem>>, vector<1x16x128xbf16>
    %163 = vector.shape_cast %162 : vector<1x16x128xbf16> to vector<16x128xbf16>
    %164 = arith.extf %163 : vector<16x128xbf16> to vector<16x128xf32>
    %165 = arith.mulf %164, %125 : vector<16x128xf32>
    %cst_118 = arith.constant dense<0.000000e+00> : vector<128xf32>
    %166 = vector.multi_reduction <add>, %165, %cst_118 [0] : vector<16x128xf32> to vector<128xf32>
    %167 = vector.shape_cast %166 : vector<128xf32> to vector<1x128xf32>
    %c7_119 = arith.constant 7 : index
    %c0_120 = arith.constant 0 : index
    %c0_121 = arith.constant 0 : index
    %168 = vector.load %arg6[%c7_119, %c0_120, %c0_121] : memref<10x16x128xbf16, #tpu.memory_space<vmem>>, vector<1x16x128xbf16>
    %169 = vector.shape_cast %168 : vector<1x16x128xbf16> to vector<16x128xbf16>
    %170 = arith.extf %169 : vector<16x128xbf16> to vector<16x128xf32>
    %171 = arith.mulf %170, %125 : vector<16x128xf32>
    %cst_122 = arith.constant dense<0.000000e+00> : vector<128xf32>
    %172 = vector.multi_reduction <add>, %171, %cst_122 [0] : vector<16x128xf32> to vector<128xf32>
    %173 = vector.shape_cast %172 : vector<128xf32> to vector<1x128xf32>
    %c8_123 = arith.constant 8 : index
    %c0_124 = arith.constant 0 : index
    %c0_125 = arith.constant 0 : index
    %174 = vector.load %arg6[%c8_123, %c0_124, %c0_125] : memref<10x16x128xbf16, #tpu.memory_space<vmem>>, vector<1x16x128xbf16>
    %175 = vector.shape_cast %174 : vector<1x16x128xbf16> to vector<16x128xbf16>
    %176 = arith.extf %175 : vector<16x128xbf16> to vector<16x128xf32>
    %177 = arith.mulf %176, %125 : vector<16x128xf32>
    %cst_126 = arith.constant dense<0.000000e+00> : vector<128xf32>
    %178 = vector.multi_reduction <add>, %177, %cst_126 [0] : vector<16x128xf32> to vector<128xf32>
    %179 = vector.shape_cast %178 : vector<128xf32> to vector<1x128xf32>
    %c9_127 = arith.constant 9 : index
    %c0_128 = arith.constant 0 : index
    %c0_129 = arith.constant 0 : index
    %180 = vector.load %arg6[%c9_127, %c0_128, %c0_129] : memref<10x16x128xbf16, #tpu.memory_space<vmem>>, vector<1x16x128xbf16>
    %181 = vector.shape_cast %180 : vector<1x16x128xbf16> to vector<16x128xbf16>
    %182 = arith.extf %181 : vector<16x128xbf16> to vector<16x128xf32>
    %183 = arith.mulf %182, %125 : vector<16x128xf32>
    %cst_130 = arith.constant dense<0.000000e+00> : vector<128xf32>
    %184 = vector.multi_reduction <add>, %183, %cst_130 [0] : vector<16x128xf32> to vector<128xf32>
    %185 = vector.shape_cast %184 : vector<128xf32> to vector<1x128xf32>
    %cst_131 = arith.constant 0.000000e+00 : f32
    %186 = vector.broadcast %cst_131 : f32 to vector<6x128xf32>
    %187 = tpu.concatenate %131, %137, %143, %149, %155, %161, %167, %173, %179, %185, %186 in 0 : vector<1x128xf32>, vector<1x128xf32>, vector<1x128xf32>, vector<1x128xf32>, vector<1x128xf32>, vector<1x128xf32>, vector<1x128xf32>, vector<1x128xf32>, vector<1x128xf32>, vector<1x128xf32>, vector<6x128xf32> -> vector<16x128xf32>
    %cst_132 = arith.constant dense<0.000000e+00> : vector<16xf32>
    %188 = vector.multi_reduction <add>, %187, %cst_132 [1] : vector<16x128xf32> to vector<16xf32>
    %189 = vector.shape_cast %188 : vector<16xf32> to vector<1x16xf32>
    %c0_133 = arith.constant 0 : index
    %c0_134 = arith.constant 0 : index
    %190 = vector.load %arg7[%c0_133, %c0_134] : memref<1x16xf32, #tpu.memory_space<vmem>>, vector<1x16xf32>
    %191 = arith.addf %189, %190 : vector<1x16xf32>
    %c1_135 = arith.constant 1 : index
    %c0_136 = arith.constant 0 : index
    %192 = vector.load %arg8[%c1_135, %c0_136] : memref<2x16xf32, #tpu.memory_space<vmem>>, vector<1x16xf32>
    tpu.vector_store %arg8[%c1_135, %c0_136], %191 {strides = array<i32>} : memref<2x16xf32, #tpu.memory_space<vmem>>, vector<1x16xf32>,
    return
  }
  func.func @transform_0(%arg0: i32) -> (i32, i32) {
    %c0_i32 = arith.constant 0 : i32
    %c0_i32_0 = arith.constant 0 : i32
    %c0_i32_1 = arith.constant 0 : i32
    return %c0_i32, %c0_i32_0 : i32, i32
  }
  func.func @transform_1(%arg0: i32) -> (i32, i32, i32) {
    %c0_i32 = arith.constant 0 : i32
    %c0_i32_0 = arith.constant 0 : i32
    %c0_i32_1 = arith.constant 0 : i32
    %c0_i32_2 = arith.constant 0 : i32
    return %c0_i32, %c0_i32_0, %c0_i32_1 : i32, i32, i32
  }
  func.func @transform_2(%arg0: i32) -> (i32, i32) {
    %c0_i32 = arith.constant 0 : i32
    %c0_i32_0 = arith.constant 0 : i32
    %c0_i32_1 = arith.constant 0 : i32
    return %c0_i32, %c0_i32_0 : i32, i32
  }
  func.func @transform_3(%arg0: i32) -> (i32, i32, i32) {
    %c0_i32 = arith.constant 0 : i32
    %c0_i32_0 = arith.constant 0 : i32
    %c0_i32_1 = arith.constant 0 : i32
    %c0_i32_2 = arith.constant 0 : i32
    return %c0_i32, %c0_i32_0, %c0_i32_1 : i32, i32, i32
  }
  func.func @transform_4(%arg0: i32) -> (i32, i32) {
    %c0_i32 = arith.constant 0 : i32
    %c0_i32_0 = arith.constant 0 : i32
    %c0_i32_1 = arith.constant 0 : i32
    return %c0_i32, %c0_i32_0 : i32, i32
  }
  func.func @transform_5(%arg0: i32) -> (i32, i32, i32) {
    %c0_i32 = arith.constant 0 : i32
    %c0_i32_0 = arith.constant 0 : i32
    %c0_i32_1 = arith.constant 0 : i32
    %c0_i32_2 = arith.constant 0 : i32
    return %c0_i32, %c0_i32_0, %c0_i32_1 : i32, i32, i32
  }
  func.func @transform_6(%arg0: i32) -> (i32, i32) {
    %c0_i32 = arith.constant 0 : i32
    %c0_i32_0 = arith.constant 0 : i32
    %c0_i32_1 = arith.constant 0 : i32
    return %c0_i32, %c0_i32_0 : i32, i32
  }
  func.func @transform_7(%arg0: i32) -> (i32, i32) {
    %c0_i32 = arith.constant 0 : i32
    %c0_i32_0 = arith.constant 0 : i32
    %c0_i32_1 = arith.constant 0 : i32
    return %c0_i32, %c0_i32_0 : i32, i32
  }
}

</mosaic_0001>

<bundles_post_ra>
// kernel: continual_model_forward.1
= control target key start
LH: loop header
LB: loop body
LE: loop exit
PB: predicated region body
PF: predicated region fallthrough
CT: control target
= control target key end

     0   :  { %v1723_v1 = vmov 0.0   ;;  %vm1724_vm0 = vmmov 0   ;;  %vm64_vm1 = vsmask.f32 7424  ;;  %vm112_vm2 = vcmask 523264   ;;  %s2252_s0 = inlined_call_operand.vmem [shape: bf16[36,64], index: 0, kind: input, shape index: {}]   ;;  %s2253_s1 = inlined_call_operand.vmem [shape: bf16[3,64,128], index: 1, kind: input, shape index: {}]   ;;  %s2254_s2 = inlined_call_operand.vmem [shape: f32[1,128], index: 2, kind: input, shape index: {}]   ;;  %s2255_s3 = inlined_call_operand.vmem [shape: bf16[3,128,128], index: 3, kind: input, shape index: {}]   ;;  %s2256_s4 = inlined_call_operand.vmem [shape: f32[1,128], index: 4, kind: input, shape index: {}]   ;;  %s2257_s5 = inlined_call_operand.vmem [shape: bf16[10,16,128], index: 5, kind: input, shape index: {}]   ;;  %s2258_s6 = inlined_call_operand.vmem [shape: f32[1,16], index: 6, kind: input, shape index: {}]   ;;  %s2259_s7 = inlined_call_operand.hbm [shape: f32[2,16], index: 7, kind: output, shape index: {}]  }
   0x1   :  { %v1658_v0 = vld [vmem:[%s2253_s1 + $0x20] sm:$0xff]   ;;  %1508 = vmatprep.subr.bf16.mxu0 %v1723_v1  ;;  %398 = vst [vmem:[#allocation2] sm:$0x1] %v1723_v1  ;;  %399 = vst [vmem:[#allocation2 + $0x11] sm:$0x1] %v1723_v1  ;;  %1528 = vmatprep.subr.bf16.mxu1 %v1723_v1  ;;  %v1660_v3 = vld [vmem:[%s2253_s1 + $0x28] sm:$0xff]  }
   0x2   :  { %402 = vst [vmem:[#allocation2 + $0x12] sm:$0x1] %v1723_v1  ;;  %403 = vst [vmem:[#allocation2 + $0x23] sm:$0x1] %v1723_v1  ;;  %v1659_v2 = vld [vmem:[%s2253_s1] sm:$0xff]   ;;  %1509 = vmatpush3.bf16.msra.mxu0 %v1658_v0  ;;  %1516 = vmatprep.mubr.msk.bf16.mxu0 %vm1724_vm0, %v1723_v1  ;;  %v1661_v4 = vld [vmem:[%s2253_s1 + $0x8] sm:$0xff]  }
   0x3   :  { %1529 = vmatpush3.bf16.msra.mxu1 %v1659_v2  ;;  %1510 = vmatprep.subr.bf16.mxu0 %v1723_v1  ;;  %v1662_v5 = vld [vmem:[%s2253_s1 + $0x30] sm:$0xff]   ;;  %v28_v7 = vld [vmem:[%s2252_s0] sm:$0xf]  ;;  %v29_v8 = vld [vmem:[%s2252_s0 + $0x4] sm:$0xf] }
   0x4   :  { %1530 = vmatprep.subr.bf16.mxu1 %v1723_v1  ;;  %1536 = vmatprep.mubr.msk.bf16.mxu1 %vm1724_vm0, %v1723_v1  ;;  %v1663_v6 = vld [vmem:[%s2253_s1 + $0x10] sm:$0xff]   ;;  %v1664_v9 = vld [vmem:[%s2253_s1 + $0x38] sm:$0xff]   ;;  %v1226_v10 = vcombine.low %v28_v7, %v29_v8  ;;  %v1811_v11 = vld [vmem:[%s2252_s0 + $0x8] sm:$0xff]  }
   0x5   :  { %v1665_v12 = vld [vmem:[%s2253_s1 + $0x18] sm:$0xff]   ;;  %v73_v15 = vshll.u32 %v1811_v11, 16  ;;  %v1670_v16 = vld [vmem:[%s2252_s0 + $0x10] ss:$0 sps:$4 sm:$0x33]   ;;  %v1668_v20 = vld [vmem:[%s2253_s1 + $0x40] sm:$0xff]  }
   0x6   :  { %1511 = vmatpush3.bf16.msra.mxu0 %v1660_v3  ;;  %v66_v13 = vshrl.u32 %v1226_v10, 16  ;;  %v68_v14 = vshll.u32 %v1226_v10, 16  ;;  %v77_v21 = vshrl.u32 %v1811_v11, 16  ;;  %v81_v22 = vshll.u32 %v1670_v16, 16  ;;  %v1669_v24 = vld [vmem:[%s2253_s1 + $0x48] sm:$0xff]   ;;  %v1671_v28 = vld [vmem:[%s2253_s1 + $0x50] sm:$0xff]  }
   0x7   :  { %1531 = vmatpush3.bf16.msra.mxu1 %v1661_v4  ;;  %1512 = vmatprep.subr.bf16.mxu0 %v1723_v1  ;;  %v75_v18 = vrot.slane %v73_v15, 1  ;;  %v85_v27 = vshrl.u32 %v1670_v16, 16  ;;  %v1673_v30 = vld [vmem:[%s2253_s1 + $0x58] sm:$0xff]   ;;  %v268_v31 = vld [vmem:[%s2252_s0] sm:$0xe] }
   0x8   :  { %1532 = vmatprep.subr.bf16.mxu1 %v1723_v1  ;;  %v70_v17 = vrot.slane %v68_v14, 1  ;;  %v83_v26 = vrot.slane %v81_v22, 1  ;;  %v1672_v32 = vld [vmem:[%s2252_s0 + $0x10] ss:$0 sps:$4 sm:$0x11]   ;;  %v1252_v34 = vcombine.low %v268_v31, %v29_v8 }
   0x9   :  { %v79_v25 = vor.u32 %v77_v21, %v75_v18 }
   0xa   :  { %1513 = vmatpush3.bf16.msra.mxu0 %v1662_v5  ;;  %v71_v19 = vor.u32 %v70_v17, %v66_v13  ;;  %v87_v33 = vor.u32 %v85_v27, %v83_v26 }
   0xb   :  { %1533 = vmatpush3.bf16.msra.mxu1 %v1663_v6  ;;  %1514 = vmatprep.subr.bf16.mxu0 %v1723_v1  ;;  %v84_v29 = vsel %vm64_vm1, %v79_v25, %v83_v26 }
   0xc   :  { %1534 = vmatprep.subr.bf16.mxu1 %v1723_v1  ;;  %v76_v23 = vsel %vm64_vm1, %v71_v19, %v75_v18 }
   0xe   :  { %1515 = vmatpush3.bf16.msra.mxu0 %v1664_v9 }
   0xf   :  { %1535 = vmatpush3.bf16.msra.mxu1 %v1665_v12  ;;  %1548 = vmatprep.subr.bf16.mxu0 %v1723_v1 }
  0x10   :  { %1568 = vmatprep.subr.bf16.mxu1 %v1723_v1 }
  0x11   :  { %1517 = vmatmul.mubr.msk.bf16.vlgmr.msra.gmra.mrb[0].mxu0 %vm112_vm2, %v76_v23 }
  0x12   :  { %1537 = vmatmul.mubr.msk.bf16.vlgmr.msra.gmra.mrb[0].mxu1 %vm112_vm2, %v1226_v10  ;;  %1549 = vmatpush3.bf16.msra.mxu0 %v1668_v20 }
  0x13   :  { %1520 = vmatprep.mubr.msk.bf16.mxu0 %vm1724_vm0, %v1723_v1  ;;  %1550 = vmatprep.subr.bf16.mxu0 %v1723_v1 }
  0x14   :  { %1540 = vmatprep.mubr.msk.bf16.mxu1 %vm1724_vm0, %v1723_v1 }
  0x16   :  { %1551 = vmatpush3.bf16.msra.mxu0 %v1669_v24 }
  0x17   :  { %1552 = vmatprep.subr.bf16.mxu0 %v1723_v1 }
  0x19   :  { %1521 = vmatmul.mubr.msk.bf16.gmra.mrb[4].mxu0 %vm112_vm2, %v84_v29 }
  0x1a   :  { %1541 = vmatmul.mubr.msk.bf16.gmra.mrb[4].mxu1 %vm112_vm2, %v1811_v11  ;;  %1553 = vmatpush3.bf16.msra.mxu0 %v1671_v28 }
  0x1b   :  { %1524 = vmatprep.mubr.msk.bf16.mxu0 %vm1724_vm0, %v1723_v1  ;;  %1544 = vmatprep.mubr.msk.bf16.mxu1 %vm1724_vm0, %v1723_v1 }
  0x1c   :  { %1554 = vmatprep.subr.bf16.mxu0 %v1723_v1 }
  0x1e   :  { %1555 = vmatpush3.bf16.msra.mxu0 %v1673_v30 }
  0x1f   :  { %1596 = vmatprep.subr.bf16.mxu0 %v1723_v1 }
  0x20   :  { %12 = vsyncpa [#allocation4], 0  ;;  %v282_v35 = vrot.slane %v1252_v34, 1  ;;  %v283_v36 = vrot.slane %v1811_v11, 1  ;;  %vm281_vm3 = vcmask 1046528   ;;  %v285_v38 = vrot.slane %v1670_v16, 1 }
  0x21   :  { %1525 = vmatmul.mubr.msk.bf16.gmra.mrb[8].mxu0 %vm112_vm2, %v87_v33  ;;  %v1675_v40 = vld [vmem:[%s2255_s3 + $0x40] sm:$0xff]   ;;  %v1677_v41 = vld [vmem:[%s2255_s3 + $0x48] sm:$0xff]   ;;  %v1679_v42 = vld [vmem:[%s2255_s3 + $0x50] sm:$0xff]   ;;  %vm954_vm4 = vcmask 1040384   ;;  %vm956_vm5 = vcmask 1041408   ;;  %vm958_vm6 = vcmask 1042432  }
  0x22   :  { %1545 = vmatmul.mubr.msk.bf16.gmra.mrb[8].mxu1 %vm112_vm2, %v1672_v32  ;;  %1556 = vmatprep.mubr.msk.bf16.mxu0 %vm1724_vm0, %v1723_v1  ;;  %v284_v37 = vsel %vm281_vm3, %v282_v35, %v283_v36  ;;  %v286_v39 = vsel %vm281_vm3, %v283_v36, %v285_v38  ;;  %v1676_v43 = vld [vmem:[%s2255_s3] sm:$0xff]   ;;  %v1681_v44 = vld [vmem:[%s2255_s3 + $0x58] sm:$0xff]   ;;  %v1678_v45 = vld [vmem:[%s2255_s3 + $0x8] sm:$0xff]   ;;  %vm964_vm7 = vcmask 1045504   ;;  %vm960_vm8 = vcmask 1043456  }
  0x23   :  { %1584 = vmatprep.mubr.msk.bf16.mxu1 %vm1724_vm0, %v1723_v1  ;;  %1569 = vmatpush3.bf16.msra.mxu1 %v1675_v40  ;;  %v1683_v46 = vld [vmem:[%s2255_s3 + $0x60] sm:$0xff]   ;;  %v1680_v47 = vld [vmem:[%s2255_s3 + $0x10] sm:$0xff]   ;;  %v1685_v48 = vld [vmem:[%s2255_s3 + $0x68] sm:$0xff]   ;;  %vm962_vm9 = vcmask 1044480   ;;  %vm1010_vm10 = vcmask 130112   ;;  %vm1013_vm11 = vcmask 122880  }
  0x24   :  { %1570 = vmatprep.subr.bf16.mxu1 %v1723_v1  ;;  %v1682_v49 = vld [vmem:[%s2255_s3 + $0x18] sm:$0xff]   ;;  %v1687_v50 = vld [vmem:[%s2255_s3 + $0x70] sm:$0xff]   ;;  %v1684_v51 = vld [vmem:[%s2255_s3 + $0x20] sm:$0xff]  }
  0x25   :  { %v1689_v52 = vld [vmem:[%s2255_s3 + $0x78] sm:$0xff]   ;;  %v1686_v53 = vld [vmem:[%s2255_s3 + $0x28] sm:$0xff]   ;;  %v1688_v54 = vld [vmem:[%s2255_s3 + $0x30] sm:$0xff]  }
  0x26   :  { %v1690_v55 = vld [vmem:[%s2255_s3 + $0x38] sm:$0xff]   ;;  %v1260_v23 = vld [vmem:[%s2254_s2] ss:$0 sm:$0xff] }
  0x27   :  { %1571 = vmatpush3.bf16.msra.mxu1 %v1677_v41  ;;  %v1691_v34 = vld [vmem:[%s2255_s3 + $0x80] sm:$0xff]  }
  0x28   :  { %1572 = vmatprep.subr.bf16.mxu1 %v1723_v1 }
  0x29   :  { %1557 = vmatmul.mubr.msk.bf16.vlgmr.msra.gmra.mrb[12].mxu0 %vm112_vm2, %v284_v37 }
  0x2a   :  { %1560 = vmatprep.mubr.msk.bf16.mxu0 %vm1724_vm0, %v1723_v1  ;;  %1597 = vmatpush3.bf16.msra.mxu0 %v1676_v43 }
  0x2b   :  { %1573 = vmatpush3.bf16.msra.mxu1 %v1679_v42  ;;  %1598 = vmatprep.subr.bf16.mxu0 %v1723_v1  ;;  %v1692_v42 = vld [vmem:[%s2255_s3 + $0x88] sm:$0xff]  }
  0x2c   :  { %1574 = vmatprep.subr.bf16.mxu1 %v1723_v1 }
  0x2e   :  { %1599 = vmatpush3.bf16.msra.mxu0 %v1678_v45 }
  0x2f   :  { %1575 = vmatpush3.bf16.msra.mxu1 %v1681_v44  ;;  %1600 = vmatprep.subr.bf16.mxu0 %v1723_v1 }
  0x30   :  { %1576 = vmatprep.subr.bf16.mxu1 %v1723_v1 }
  0x31   :  { %1561 = vmatmul.mubr.msk.bf16.gmra.mrb[16].mxu0 %vm112_vm2, %v286_v39 }
  0x32   :  { %1564 = vmatprep.mubr.msk.bf16.mxu0 %vm1724_vm0, %v1723_v1  ;;  %1601 = vmatpush3.bf16.msra.mxu0 %v1680_v47 }
  0x33   :  { %1577 = vmatpush3.bf16.msra.mxu1 %v1683_v46  ;;  %1602 = vmatprep.subr.bf16.mxu0 %v1723_v1 }
  0x34   :  { %1578 = vmatprep.subr.bf16.mxu1 %v1723_v1 }
  0x36   :  { %1603 = vmatpush3.bf16.msra.mxu0 %v1682_v49  ;;  %v1693_v49 = vld [vmem:[%s2255_s3 + $0x90] sm:$0xff]  }
  0x37   :  { %1579 = vmatpush3.bf16.msra.mxu1 %v1685_v48  ;;  %1604 = vmatprep.subr.bf16.mxu0 %v1723_v1 }
  0x38   :  { %1580 = vmatprep.subr.bf16.mxu1 %v1723_v1 }
  0x39   :  { %1565 = vmatmul.mubr.msk.bf16.gmra.mrb[20].mxu0 %vm112_vm2, %v285_v38 }
  0x3a   :  { %1612 = vmatprep.mubr.msk.bf16.mxu0 %vm1724_vm0, %v1723_v1  ;;  %1605 = vmatpush3.bf16.msra.mxu0 %v1684_v51 }
  0x3b   :  { %1581 = vmatpush3.bf16.msra.mxu1 %v1687_v50  ;;  %1606 = vmatprep.subr.bf16.mxu0 %v1723_v1 }
  0x3c   :  { %1582 = vmatprep.subr.bf16.mxu1 %v1723_v1 }
  0x3e   :  { %1607 = vmatpush3.bf16.msra.mxu0 %v1686_v53 }
  0x3f   :  { %1583 = vmatpush3.bf16.msra.mxu1 %v1689_v52  ;;  %1608 = vmatprep.subr.bf16.mxu0 %v1723_v1 }
  0x40   :  { %1624 = vmatprep.subr.bf16.mxu1 %v1723_v1 }
  0x42   :  { %1609 = vmatpush3.bf16.msra.mxu0 %v1688_v54 }
  0x43   :  { %1610 = vmatprep.subr.bf16.mxu0 %v1723_v1 }
  0x46   :  { %1611 = vmatpush3.bf16.msra.mxu0 %v1690_v55 }
  0xe4   :  { %v156_v56 = vpop.f32.mrb[0].mxu0 }
  0xe5   :  { %v246_v57 = vpop.f32.mrb[0].mxu1  ;;  %v1518_v59 = vpop.f32.mrb[1].mxu0 }
  0xe6   :  { %v247_v58 = vadd.f32 %v246_v57, %v156_v56  ;;  %v1538_v60 = vpop.f32.mrb[1].mxu1  ;;  %v159_v61 = vpop.f32.mrb[2].mxu0  ;;  %v1694_v56 = vld [vmem:[%s2255_s3 + $0x98] sm:$0xff]  }
  0xe7   :  { %v249_v62 = vpop.f32.mrb[2].mxu1  ;;  %v1519_v0 = vpop.f32.mrb[3].mxu0 }
  0xe8   :  { %v250_v63 = vadd.f32 %v249_v62, %v159_v61  ;;  %v1539_v2 = vpop.f32.mrb[3].mxu1  ;;  %v1695_v62 = vld [vmem:[%s2255_s3 + $0xa0] sm:$0xff]   ;;  %v1696_v0 = vld [vmem:[%s2255_s3 + $0xa8] sm:$0xff]  }
  0xec   :  { %v164_v3 = vpop.f32.mrb[4].mxu0 }
  0xed   :  { %v254_v4 = vpop.f32.mrb[4].mxu1  ;;  %v1522_v6 = vpop.f32.mrb[5].mxu0 }
  0xee   :  { %v255_v5 = vadd.f32 %v254_v4, %v164_v3  ;;  %v1542_v7 = vpop.f32.mrb[5].mxu1  ;;  %v167_v8 = vpop.f32.mrb[6].mxu0 }
  0xef   :  { %v257_v9 = vpop.f32.mrb[6].mxu1  ;;  %v1523_v11 = vpop.f32.mrb[7].mxu0  ;;  %v1698_v7 = vld [vmem:[%s2255_s3 + $0xb8] sm:$0xff]  }
  0xf0   :  { %v258_v10 = vadd.f32 %v257_v9, %v167_v8  ;;  %v1543_v12 = vpop.f32.mrb[7].mxu1 }
  0xf4   :  { %v172_v13 = vpop.f32.mrb[8].mxu0 }
  0xf5   :  { %v262_v14 = vpop.f32.mrb[8].mxu1  ;;  %v1526_v15 = vpop.f32.mrb[9].mxu0 }
  0xf6   :  { %v263_v16 = vadd.f32 %v262_v14, %v172_v13  ;;  %v1546_v17 = vpop.f32.mrb[9].mxu1  ;;  %v175_v18 = vpop.f32.mrb[10].mxu0 }
  0xf7   :  { %v265_v19 = vpop.f32.mrb[10].mxu1  ;;  %v1527_v20 = vpop.f32.mrb[11].mxu0 }
  0xf8   :  { %v1547_v21 = vpop.f32.mrb[11].mxu1 }
  0xfc   :  { %v354_v22 = vpop.f32.mrb[12].mxu0 }
  0xfd   :  { %v376_v24 = vadd.f32 %v354_v22, %v247_v58  ;;  %v1558_v25 = vpop.f32.mrb[13].mxu0 }
  0xfe   :  { %v357_v26 = vpop.f32.mrb[14].mxu0 }
  0xff   :  { %v388_v27 = vadd.f32 %v1260_v23, %v376_v24  ;;  %v377_v28 = vadd.f32 %v357_v26, %v250_v63  ;;  %v1559_v29 = vpop.f32.mrb[15].mxu0 }
 0x101   :  { %v393_v30 = vmax.f32 %v388_v27, 0.0  ;;  %v389_v31 = vadd.f32 %v1260_v23, %v377_v28 }
 0x103   :  { %400 = vst [vmem:[#allocation2 + $0x1] sm:$0xff] %v393_v30  ;;  %v394_v32 = vmax.f32 %v389_v31, 0.0 }
 0x104   :  { %v362_v33 = vpop.f32.mrb[16].mxu0 }
 0x105   :  { %401 = vst [vmem:[#allocation2 + $0x9] sm:$0xff] %v394_v32  ;;  %v378_v35 = vadd.f32 %v362_v33, %v255_v5  ;;  %v1562_v36 = vpop.f32.mrb[17].mxu0  ;;  %v436_v37 = vpack.c.bf16 %v394_v32, %v393_v30  ;;  %v1697_v5 = vld [vmem:[%s2255_s3 + $0xb0] sm:$0xff]  }
 0x106   :  { %v365_v38 = vpop.f32.mrb[18].mxu0 }
 0x107   :  { %v390_v39 = vadd.f32 %v1260_v23, %v378_v35  ;;  %v379_v40 = vadd.f32 %v365_v38, %v258_v10  ;;  %v1563_v41 = vpop.f32.mrb[19].mxu0  ;;  %1585 = vmatmul.mubr.bf16.vlgmr.msra.gmra.mrb[12].mxu1 %v436_v37 }
 0x108   :  { %1625 = vmatpush3.bf16.msra.mxu1 %v1691_v34  ;;  %1588 = vmatprep.mubr.msk.bf16.mxu1 %vm1724_vm0, %v1723_v1 }
 0x109   :  { %v395_v43 = vmax.f32 %v390_v39, 0.0  ;;  %v391_v44 = vadd.f32 %v1260_v23, %v379_v40  ;;  %1626 = vmatprep.subr.bf16.mxu1 %v1723_v1 }
 0x10a   :  { %v407_v47 = vld [vmem:[#allocation2] sm:$0xff] }
 0x10b   :  { %404 = vst [vmem:[#allocation2 + $0x11] sm:$0xfc] %v395_v43  ;;  %v396_v45 = vmax.f32 %v391_v44, 0.0 }
 0x10c   :  { %v370_v46 = vpop.f32.mrb[20].mxu0  ;;  %v408_v48 = vld [vmem:[#allocation2 + $0x8] sm:$0xff]  ;;  %1627 = vmatpush3.bf16.msra.mxu1 %v1692_v42 }
 0x10d   :  { %405 = vst [vmem:[#allocation2 + $0x19] sm:$0xff] %v396_v45  ;;  %v380_v50 = vadd.f32 %v370_v46, %v263_v16  ;;  %v412_v51 = vpack.c.bf16 %v408_v48, %v407_v47  ;;  %v1566_v52 = vpop.f32.mrb[21].mxu0  ;;  %1628 = vmatprep.subr.bf16.mxu1 %v1723_v1  ;;  %v664_v8 = vld [vmem:[#allocation2 + $0x2] sm:$0xff]  ;;  %v665_v9 = vld [vmem:[#allocation2 + $0xa] sm:$0xff]  ;;  %v1994_v16 = vld [vmem:[%s2258_s6] ss:$0 sm:$0xff] }
 0x10e   :  { %v373_v53 = vpop.f32.mrb[22].mxu0  ;;  %v669_v10 = vpack.c.bf16 %v665_v9, %v664_v8  ;;  %985 = vbcast.lane.b32.xlu1 %v1994_v16, 264  ;;  %v2012_v46 = vld [vmem:[%s2257_s5 + $0x8] sm:$0xff]   ;;  %v2017_v47 = vld [vmem:[%s2257_s5 + $0x10] sm:$0xff]   ;;  %v2022_v48 = vld [vmem:[%s2257_s5 + $0x40] sm:$0xff]  }
 0x10f   :  { %v392_v54 = vadd.f32 %v1260_v23, %v380_v50  ;;  %1613 = vmatmul.mubr.bf16.vlgmr.msra.gmra.mrb[24].mxu0 %v412_v51  ;;  %v1567_v55 = vpop.f32.mrb[23].mxu0  ;;  %v2032_v50 = vld [vmem:[%s2257_s5 + $0x18] sm:$0xff]   ;;  %v2037_v52 = vld [vmem:[%s2256_s4] ss:$0 sm:$0xff]  ;;  %v2063_v8 = vld [vmem:[%s2257_s5 + $0x30] sm:$0xff]  }
 0x110   :  { %1616 = vmatprep.mubr.msk.bf16.mxu0 %vm1724_vm0, %v1723_v1  ;;  %1629 = vmatpush3.bf16.msra.mxu1 %v1693_v49  ;;  %v2027_v49 = vld [vmem:[%s2257_s5 + $0x48] sm:$0xff]   ;;  %v2068_v9 = vld [vmem:[%s2257_s5 + $0x38] sm:$0xff]  }
 0x111   :  { %v397_v57 = vmax.f32 %v392_v54, 0.0  ;;  %1630 = vmatprep.subr.bf16.mxu1 %v1723_v1 }
 0x112   :  { %v433_v58 = vld [vmem:[#allocation2 + $0x11] sm:$0xff]  ;;  %1175 = vbcast.lane.b32.xlu1 %v1994_v16, 256 }
 0x113   :  { %406 = vst [vmem:[#allocation2 + $0x21] sm:$0x3] %v397_v57  ;;  %v437_v59 = vpack.c.bf16 %v396_v45, %v433_v58  ;;  %v409_v60 = vld [vmem:[#allocation2 + $0x10] sm:$0xff]  ;;  %v2007_v45 = vld [vmem:[%s2257_s5] sm:$0xff]   ;;  %v2265_v57 = vunpack.c.l.bf16 %v2017_v47  ;;  %v1390_v58 = vunpack.c.l.bf16 %v2022_v48 }
 0x114   :  { %v410_v61 = vld [vmem:[#allocation2 + $0x18] sm:$0xff]  ;;  %1631 = vmatpush3.bf16.msra.mxu1 %v1694_v56  ;;  %v1358_v53 = vunpack.c.l.bf16 %v2007_v45  ;;  %v1362_v56 = vunpack.c.l.bf16 %v2012_v46 }
 0x115   :  { %1589 = vmatmul.mubr.bf16.gmra.mrb[16].mxu1 %v437_v59  ;;  %v413_v63 = vpack.c.bf16 %v410_v61, %v409_v60  ;;  %1632 = vmatprep.subr.bf16.mxu1 %v1723_v1  ;;  %v666_v12 = vld [vmem:[#allocation2 + $0x12] sm:$0xff]  ;;  %v2046_v59 = vld [vmem:[%s2257_s5 + $0x20] sm:$0xff]   ;;  %v1359_v61 = vunpack.c.h.bf16 %v2007_v45  ;;  %v2266_v45 = vunpack.c.l.bf16 %v2017_v47 }
 0x116   :  { %1592 = vmatprep.mubr.msk.bf16.mxu1 %vm1724_vm0, %v1723_v1 }
 0x117   :  { %1617 = vmatmul.mubr.bf16.gmra.mrb[28].mxu0 %v413_v63  ;;  %v1394_v63 = vunpack.c.l.bf16 %v2027_v49 }
 0x118   :  { %1620 = vmatprep.mubr.msk.bf16.mxu0 %vm1724_vm0, %v1723_v1  ;;  %1633 = vmatpush3.bf16.msra.mxu1 %v1695_v62  ;;  %v1363_v62 = vunpack.c.h.bf16 %v2012_v46 }
 0x119   :  { %1634 = vmatprep.subr.bf16.mxu1 %v1723_v1 }
 0x11a   :  { %v435_v2 = vld [vmem:[#allocation2 + $0x21] sm:$0x3] }
 0x11b   :  { %v411_v3 = vld [vmem:[#allocation2 + $0x20] sm:$0x3]  ;;  %v438_v4 = vpack.c.bf16 %v435_v2, %v435_v2  ;;  %v668_v14 = vld [vmem:[#allocation2 + $0x22] sm:$0x3]  ;;  %v2055_v2 = vld [vmem:[%s2257_s5 + $0x28] sm:$0xff]   ;;  %s1726_s5 = smov [#allocation3]  }
 0x11c   :  { %1635 = vmatpush3.bf16.msra.mxu1 %v1696_v0  ;;  %v414_v6 = vpack.c.bf16 %v411_v3, %v411_v3  ;;  %v667_v11 = vld [vmem:[#allocation2 + $0x1a] sm:$0xff]  ;;  %v671_v15 = vpack.c.bf16 %v668_v14, %v668_v14  ;;  %v2262_v0 = vunpack.c.l.bf16 %v2032_v50  ;;  %s1210_s8 = sshll.u32 %s1726_s5, 4  ;;  %s1211_s8 = int_to_ptr.vmem [resolvable:$true] %s1210_s8 }
 0x11d   :  { %1593 = vmatmul.mubr.bf16.gmra.mrb[20].mxu1 %v438_v4  ;;  %1636 = vmatprep.subr.bf16.mxu1 %v1723_v1  ;;  %v670_v13 = vpack.c.bf16 %v667_v11, %v666_v12  ;;  %v2261_v11 = vunpack.c.h.bf16 %v2032_v50  ;;  %v2260_v12 = vunpack.c.l.bf16 %v2046_v59  ;;  %s1699_s9 = scalar_lea.vmem %s1211_s8, 32  ;;  %p1704_p1 = scmp.lt.s32.totalorder %s1211_s8, %s1211_s8 }
 0x11e   :  { %1640 = vmatprep.mubr.msk.bf16.mxu1 %vm1724_vm0, %v1723_v1  ;;  %p1700_p0 = scmp.ne.s32.totalorder %s1211_s8, %s1699_s9  ;;  %p1705_p2 = scmp.lt.s32.totalorder %s1699_s9, %s1699_s9 }
 0x11f   :  { %1621 = vmatmul.mubr.bf16.gmra.mrb[32].mxu0 %v414_v6  ;;  %v2264_v6 = vunpack.c.h.bf16 %v2017_v47 }
 0x120   :  { %1637 = vmatpush3.bf16.msra.mxu1 %v1697_v5  ;;  %p1706_p3 = por %p1705_p2, %p1704_p1 }
 0x121   :  { %1638 = vmatprep.subr.bf16.mxu1 %v1723_v1 }
 0x122   :  { %p1707_p4 = pnand %p1706_p3, %p1700_p0 }
 0x124   :  { %1639 = vmatpush3.bf16.msra.mxu1 %v1698_v7  ;;  %v1391_v7 = vunpack.c.h.bf16 %v2022_v48 }
 0x127   :  { %1641 = vmatmul.mubr.bf16.vlgmr.msra.gmra.mrb[24].mxu1 %v669_v10  ;;  %v1395_v10 = vunpack.c.h.bf16 %v2027_v49 }
 0x128   :  { %1644 = vmatprep.mubr.msk.bf16.mxu1 %vm1724_vm0, %v1723_v1 }
 0x12f   :  { %1645 = vmatmul.mubr.bf16.gmra.mrb[28].mxu1 %v670_v13  ;;  %v2263_v13 = vunpack.c.h.bf16 %v2046_v59 }
 0x130   :  { %1648 = vmatprep.mubr.msk.bf16.mxu1 %vm1724_vm0, %v1723_v1 }
 0x137   :  { %1649 = vmatmul.mubr.bf16.gmra.mrb[32].mxu1 %v671_v15 }
 0x1da   :  { %v538_v17 = vpop.f32.mrb[12].mxu1 }
 0x1db   :  { %v1586_v18 = vpop.f32.mrb[13].mxu1 }
 0x1dc   :  { %v541_v19 = vpop.f32.mrb[14].mxu1  ;;  %v1379_v18 = vunpack.c.h.bf16 %v2055_v2 }
 0x1dd   :  { %v1587_v20 = vpop.f32.mrb[15].mxu1 }
 0x1de   :  { %v1383_v20 = vunpack.c.h.bf16 %v2063_v8 }
 0x1e2   :  { %v642_v21 = vpop.f32.mrb[24].mxu0 }
 0x1e3   :  { %v643_v22 = vadd.f32 %v642_v21, %v538_v17  ;;  %v1614_v23 = vpop.f32.mrb[25].mxu0  ;;  %v1378_v17 = vunpack.c.l.bf16 %v2055_v2  ;;  %v1386_v21 = vunpack.c.l.bf16 %v2068_v9 }
 0x1e4   :  { %v645_v1 = vpop.f32.mrb[26].mxu0 }
 0x1e5   :  { %v646_v24 = vadd.f32 %v645_v1, %v541_v19  ;;  %v1615_v25 = vpop.f32.mrb[27].mxu0  ;;  %v1382_v19 = vunpack.c.l.bf16 %v2063_v8 }
 0x1e8   :  { %v546_v26 = vpop.f32.mrb[16].mxu1 }
 0x1e9   :  { %v1590_v27 = vpop.f32.mrb[17].mxu1 }
 0x1ea   :  { %v650_v28 = vpop.f32.mrb[28].mxu0  ;;  %v549_v29 = vpop.f32.mrb[18].mxu1 }
 0x1eb   :  { %v1998_v30 = vadd.f32 %v650_v28, %v546_v26  ;;  %v1618_v31 = vpop.f32.mrb[29].mxu0  ;;  %v1591_v32 = vpop.f32.mrb[19].mxu1 }
 0x1ec   :  { %v653_v33 = vpop.f32.mrb[30].mxu0 }
 0x1ed   :  { %v2000_v34 = vadd.f32 %v653_v33, %v549_v29  ;;  %v1619_v35 = vpop.f32.mrb[31].mxu0 }
 0x1f0   :  { %v554_v36 = vpop.f32.mrb[20].mxu1 }
 0x1f1   :  { %v1594_v37 = vpop.f32.mrb[21].mxu1 }
 0x1f2   :  { %v658_v38 = vpop.f32.mrb[32].mxu0  ;;  %v557_v39 = vpop.f32.mrb[22].mxu1 }
 0x1f3   :  { %v2002_v40 = vadd.f32 %v658_v38, %v554_v36  ;;  %v1622_v41 = vpop.f32.mrb[33].mxu0  ;;  %v1595_v42 = vpop.f32.mrb[23].mxu1 }
 0x1f4   :  { %v661_v43 = vpop.f32.mrb[34].mxu0 }
 0x1f5   :  { %v1623_v44 = vpop.f32.mrb[35].mxu0 }
 0x1fa   :  { %v771_v51 = vpop.f32.mrb[24].mxu1 }
 0x1fb   :  { %v793_v54 = vadd.f32 %v771_v51, %v643_v22  ;;  %v1642_v55 = vpop.f32.mrb[25].mxu1  ;;  %v1387_v22 = vunpack.c.h.bf16 %v2068_v9 }
 0x1fc   :  { %v774_v60 = vpop.f32.mrb[26].mxu1 }
 0x1fd   :  { %v805_v3 = vadd.f32 %v2037_v52, %v793_v54  ;;  %v794_v4 = vadd.f32 %v774_v60, %v646_v24  ;;  %v1643_v5 = vpop.f32.mrb[27].mxu1 }
 0x1ff   :  { %v2074_v14 = vmax.f32 %v805_v3, 0.0  ;;  %v806_v15 = vadd.f32 %v2037_v52, %v794_v4 }
 0x201   :  { %v2083_v23 = vmax.f32 %v806_v15, 0.0  ;;  %v819_v1 = vmul.f32 %v1358_v53, %v2074_v14  ;;  %v833_v24 = vmul.f32 %v1362_v56, %v2074_v14  ;;  %v847_v25 = vmul.f32 %v2265_v57, %v2074_v14 }
 0x202   :  { %v779_v26 = vpop.f32.mrb[28].mxu1  ;;  %v931_v27 = vmul.f32 %v1390_v58, %v2074_v14  ;;  %v945_v28 = vmul.f32 %v1394_v63, %v2074_v14  ;;  %v861_v29 = vmul.f32 %v2262_v0, %v2074_v14  ;;  %v875_v31 = vmul.f32 %v2260_v12, %v2074_v14 }
 0x203   :  { %v795_v32 = vadd.f32 %v779_v26, %v1998_v30  ;;  %v1646_v33 = vpop.f32.mrb[29].mxu1  ;;  %v932_v35 = vmul.f32 %v1391_v7, %v2083_v23  ;;  %v946_v36 = vmul.f32 %v1395_v10, %v2083_v23  ;;  %v820_v37 = vmul.f32 %v1359_v61, %v2083_v23 }
 0x204   :  { %v782_v38 = vpop.f32.mrb[30].mxu1  ;;  %v834_v39 = vmul.f32 %v1363_v62, %v2083_v23  ;;  %v848_v30 = vmul.f32 %v2264_v6, %v2083_v23  ;;  %v862_v41 = vmul.f32 %v2261_v11, %v2083_v23  ;;  %v876_v42 = vmul.f32 %v2263_v13, %v2083_v23 }
 0x205   :  { %v807_v43 = vadd.f32 %v2037_v52, %v795_v32  ;;  %v796_v44 = vadd.f32 %v782_v38, %v2000_v34  ;;  %v1647_v51 = vpop.f32.mrb[31].mxu1  ;;  %v933_v54 = vadd.f32 %v932_v35, %v931_v27  ;;  %v947_v55 = vadd.f32 %v946_v36, %v945_v28 }
 0x206   :  { %v821_v60 = vadd.f32 %v820_v37, %v819_v1  ;;  %v835_v3 = vadd.f32 %v834_v39, %v833_v24  ;;  %v849_v4 = vadd.f32 %v848_v30, %v847_v25  ;;  %v863_v5 = vadd.f32 %v862_v41, %v861_v29 }
 0x207   :  { %v812_v15 = vmax.f32 %v807_v43, 0.0  ;;  %v808_v26 = vadd.f32 %v2037_v52, %v796_v44  ;;  %v934_v33 = vrot.slane %v933_v54, 4  ;;  %v948_v12 = vrot.slane %v947_v55, 4 }
 0x208   :  { %v822_v11 = vrot.slane %v821_v60, 4  ;;  %v836_v0 = vrot.slane %v835_v3, 4  ;;  %v850_v13 = vrot.slane %v849_v4, 4  ;;  %v864_v6 = vrot.slane %v863_v5, 4 }
 0x209   :  { %v2131_v32 = vrot.slane %v812_v15, 2  ;;  %v813_v34 = vmax.f32 %v808_v26, 0.0  ;;  %v935_v38 = vadd.f32 %v934_v33, %v933_v54  ;;  %v949_v27 = vadd.f32 %v948_v12, %v947_v55 }
 0x20a   :  { %v787_v1 = vpop.f32.mrb[32].mxu1  ;;  %v823_v24 = vadd.f32 %v822_v11, %v821_v60  ;;  %v837_v25 = vadd.f32 %v836_v0, %v835_v3  ;;  %v851_v28 = vadd.f32 %v850_v13, %v849_v4  ;;  %v865_v29 = vadd.f32 %v864_v6, %v863_v5 }
 0x20b   :  { %v1023_v35 = vrot.slane %v813_v34, 2  ;;  %v797_v36 = vadd.f32 %v787_v1, %v2002_v40  ;;  %v1650_v37 = vpop.f32.mrb[33].mxu1  ;;  %v936_v39 = vrot.slane %v935_v38, 2  ;;  %v950_v30 = vrot.slane %v949_v27, 2 }
 0x20c   :  { %v790_v41 = vpop.f32.mrb[34].mxu1  ;;  %v824_v43 = vrot.slane %v823_v24, 2  ;;  %v838_v44 = vrot.slane %v837_v25, 2  ;;  %v852_v51 = vrot.slane %v851_v28, 2  ;;  %v866_v54 = vrot.slane %v865_v29, 2 }
 0x20d   :  { %v809_v12 = vadd.f32 %v2037_v52, %v797_v36  ;;  %v1651_v55 = vpop.f32.mrb[35].mxu1  ;;  %v937_v11 = vadd.f32 %v936_v39, %v935_v38  ;;  %v951_v0 = vadd.f32 %v950_v30, %v949_v27  ;;  %v877_v13 = vadd.f32 %v876_v42, %v875_v31 }
 0x20e   :  { %v825_v6 = vadd.f32 %v824_v43, %v823_v24  ;;  %v839_v60 = vadd.f32 %v838_v44, %v837_v25  ;;  %v853_v3 = vadd.f32 %v852_v51, %v851_v28  ;;  %v867_v40 = vadd.f32 %v866_v54, %v865_v29 }
 0x20f   :  { %v814_v4 = vmax.f32 %v809_v12, 0.0  ;;  %v938_v5 = vrot.slane %v937_v11, 1  ;;  %v952_v15 = vrot.slane %v951_v0, 1  ;;  %v878_v26 = vrot.slane %v877_v13, 4 }
 0x210   :  { %v826_v33 = vrot.slane %v825_v6, 1  ;;  %v840_v34 = vrot.slane %v839_v60, 1  ;;  %v854_v1 = vrot.slane %v853_v3, 1  ;;  %v868_v37 = vrot.slane %v867_v40, 1 }
 0x211   :  { %v1025_v41 = vrot.slane %v814_v4, 2  ;;  %v939_v57 = vadd.f32 %v938_v5, %v937_v11  ;;  %v953_v52 = vadd.f32 %v952_v15, %v951_v0  ;;  %v879_v36 = vadd.f32 %v878_v26, %v877_v13 }
 0x212   :  { %v827_v38 = vadd.f32 %v826_v33, %v825_v6  ;;  %v841_v27 = vadd.f32 %v840_v34, %v839_v60  ;;  %v855_v31 = vadd.f32 %v854_v1, %v853_v3  ;;  %v869_v42 = vadd.f32 %v868_v37, %v867_v40 }
 0x213   :  { %v968_v24 = vsel %vm954_vm4, %v939_v57, %v953_v52  ;;  %v880_v25 = vrot.slane %v879_v36, 2  ;;  %v889_v28 = vmul.f32 %v1378_v17, %v2074_v14  ;;  %v890_v29 = vmul.f32 %v1379_v18, %v2083_v23 }
 0x214   :  { %v969_v39 = vsel %vm956_vm5, %v968_v24, 0.0  ;;  %v955_v30 = vsel %vm954_vm4, %v827_v38, %v841_v27  ;;  %v903_v43 = vmul.f32 %v1382_v19, %v2074_v14  ;;  %v904_v57 = vmul.f32 %v1383_v20, %v2083_v23 }
 0x215   :  { %972 = vadd.xlane.f32.xlu0 %v969_v39  ;;  %v957_v44 = vsel %vm956_vm5, %v955_v30, %v855_v31  ;;  %v881_v51 = vadd.f32 %v880_v25, %v879_v36  ;;  %v891_v54 = vadd.f32 %v890_v29, %v889_v28  ;;  %v917_v12 = vmul.f32 %v1386_v21, %v2074_v14 }
 0x216   :  { %v905_v55 = vadd.f32 %v904_v57, %v903_v43  ;;  %v918_v11 = vmul.f32 %v1387_v22, %v2083_v23  ;;  %v959_v0 = vsel %vm958_vm6, %v957_v44, %v869_v42  ;;  %v2160_v13 = vsel %vm964_vm7, %v2131_v32, %v1023_v35 }
 0x217   :  { %v882_v6 = vrot.slane %v881_v51, 1  ;;  %v892_v60 = vrot.slane %v891_v54, 4  ;;  %v2163_v3 = vsel %vm964_vm7, %v1023_v35, %v1025_v41  ;;  %v1133_v14 = vmul.f32 %v1390_v58, %v2160_v13 }
 0x218   :  { %v906_v40 = vrot.slane %v905_v55, 4  ;;  %v919_v4 = vadd.f32 %v918_v11, %v917_v12  ;;  %v1134_v23 = vmul.f32 %v1391_v7, %v2163_v3  ;;  %v1146_v32 = vmul.f32 %v1394_v63, %v2160_v13 }
 0x219   :  { %v883_v5 = vadd.f32 %v882_v6, %v881_v51  ;;  %v893_v15 = vadd.f32 %v892_v60, %v891_v54  ;;  %v1147_v35 = vmul.f32 %v1395_v10, %v2163_v3  ;;  %v1029_v58 = vmul.f32 %v1358_v53, %v2160_v13 }
 0x21a   :  { %v907_v26 = vadd.f32 %v906_v40, %v905_v55  ;;  %v920_v33 = vrot.slane %v919_v4, 4  ;;  %v1135_v34 = vadd.f32 %v1134_v23, %v1133_v14  ;;  %v1030_v48 = vmul.f32 %v1359_v61, %v2163_v3 }
 0x21b   :  { %v894_v7 = vrot.slane %v893_v15, 2  ;;  %v961_v63 = vsel %vm960_vm8, %v959_v0, %v883_v5  ;;  %v1148_v1 = vadd.f32 %v1147_v35, %v1146_v32  ;;  %v1042_v49 = vmul.f32 %v1362_v56, %v2160_v13 }
 0x21c   :  { %v908_v10 = vrot.slane %v907_v26, 2  ;;  %v921_v37 = vadd.f32 %v920_v33, %v919_v4  ;;  %v1136_v41 = vrot.slane %v1135_v34, 4  ;;  %v1031_v52 = vadd.f32 %v1030_v48, %v1029_v58 }
 0x21d   :  { %v895_v53 = vadd.f32 %v894_v7, %v893_v15  ;;  %v1149_v36 = vrot.slane %v1148_v1, 4  ;;  %v1043_v38 = vmul.f32 %v1363_v62, %v2163_v3  ;;  %v1055_v61 = vmul.f32 %v2266_v45, %v2160_v13 }
 0x21e   :  { %v909_v27 = vadd.f32 %v908_v10, %v907_v26  ;;  %v922_v31 = vrot.slane %v921_v37, 2  ;;  %v1137_v42 = vadd.f32 %v1136_v41, %v1135_v34  ;;  %v1032_v24 = vrot.slane %v1031_v52, 4 }
 0x21f   :  { %v896_v25 = vrot.slane %v895_v53, 1  ;;  %v1150_v56 = vadd.f32 %v1149_v36, %v1148_v1  ;;  %v1044_v28 = vadd.f32 %v1043_v38, %v1042_v49  ;;  %v2267_v29 = vunpack.c.h.bf16 %v2017_v47 }
 0x220   :  { %v910_v30 = vrot.slane %v909_v27, 1  ;;  %v923_v43 = vadd.f32 %v922_v31, %v921_v37  ;;  %v1138_v57 = vrot.slane %v1137_v42, 2  ;;  %v1033_v46 = vadd.f32 %v1032_v24, %v1031_v52 }
 0x221   :  { %v1056_v39 = vmul.f32 %v2267_v29, %v2163_v3  ;;  %v897_v62 = vadd.f32 %v896_v25, %v895_v53  ;;  %v1151_v44 = vrot.slane %v1150_v56, 2  ;;  %v1045_v51 = vrot.slane %v1044_v28, 4 }
 0x222   :  { %v911_v12 = vadd.f32 %v910_v30, %v909_v27  ;;  %v924_v55 = vrot.slane %v923_v43, 1  ;;  %v1139_v11 = vadd.f32 %v1138_v57, %v1137_v42  ;;  %v1034_v0 = vrot.slane %v1033_v46, 2 }
 0x223   :  { %v1057_v54 = vadd.f32 %v1056_v39, %v1055_v61  ;;  %v963_v6 = vsel %vm962_vm9, %v961_v63, %v897_v62  ;;  %v1152_v60 = vadd.f32 %v1151_v44, %v1150_v56  ;;  %v1046_v14 = vadd.f32 %v1045_v51, %v1044_v28 }
 0x224   :  { %v925_v4 = vadd.f32 %v924_v55, %v923_v43  ;;  %v965_v47 = vsel %vm964_vm7, %v963_v6, %v911_v12  ;;  %v1140_v23 = vrot.slane %v1139_v11, 1  ;;  %v1035_v32 = vadd.f32 %v1034_v0, %v1033_v46 }
 0x225   :  { %v1058_v40 = vrot.slane %v1057_v54, 4  ;;  %v1153_v5 = vrot.slane %v1152_v60, 1  ;;  %v1047_v15 = vrot.slane %v1046_v14, 2  ;;  %v2268_v58 = vunpack.c.l.bf16 %v2032_v50 }
 0x226   :  { %v967_v33 = vsel %vm281_vm3, %v965_v47, %v925_v4  ;;  %v1141_v34 = vadd.f32 %v1140_v23, %v1139_v11  ;;  %v1036_v48 = vrot.slane %v1035_v32, 1  ;;  %v2269_v7 = vunpack.c.h.bf16 %v2032_v50 }
 0x227   :  { %v1059_v35 = vadd.f32 %v1058_v40, %v1057_v54  ;;  %v1068_v26 = vmul.f32 %v2268_v58, %v2160_v13  ;;  %970 = vadd.xlane.f32.xlu0 %v967_v33  ;;  %v1154_v1 = vadd.f32 %v1153_v5, %v1152_v60  ;;  %v1048_v49 = vadd.f32 %v1047_v15, %v1046_v14 }
 0x228   :  { %v1069_v63 = vmul.f32 %v2269_v7, %v2163_v3  ;;  %v2270_v37 = vunpack.c.l.bf16 %v2046_v59  ;;  %v1037_v52 = vadd.f32 %v1036_v48, %v1035_v32  ;;  %v2271_v36 = vunpack.c.h.bf16 %v2046_v59 }
 0x229   :  { %v1060_v10 = vrot.slane %v1059_v35, 2  ;;  %v1094_v45 = vmul.f32 %v1378_v17, %v2160_v13  ;;  %v1162_v50 = vsel %vm954_vm4, %v1141_v34, %v1154_v1  ;;  %v1049_v61 = vrot.slane %v1048_v49, 1 }
 0x22a   :  { %v1081_v41 = vmul.f32 %v2270_v37, %v2160_v13  ;;  %v1070_v53 = vadd.f32 %v1069_v63, %v1068_v26  ;;  %v1082_v38 = vmul.f32 %v2271_v36, %v2163_v3  ;;  %v1095_v31 = vmul.f32 %v1379_v18, %v2163_v3 }
 0x22b   :  { %v1061_v27 = vadd.f32 %v1060_v10, %v1059_v35  ;;  %v1163_v42 = vsel %vm956_vm5, %v1162_v50, 0.0  ;;  %v1107_v59 = vmul.f32 %v1382_v19, %v2160_v13  ;;  %v1050_v56 = vadd.f32 %v1049_v61, %v1048_v49  ;;  %v986_v49 = vpop.permute.xlu1 %985 }
 0x22c   :  { %v1071_v24 = vrot.slane %v1070_v53, 4  ;;  %v1083_v25 = vadd.f32 %v1082_v38, %v1081_v41  ;;  %1166 = vadd.xlane.f32.xlu1 %v1163_v42  ;;  %v1096_v17 = vadd.f32 %v1095_v31, %v1094_v45  ;;  %v1108_v29 = vmul.f32 %v1383_v20, %v2163_v3 }
 0x22d   :  { %v1062_v28 = vrot.slane %v1061_v27, 1  ;;  %v1120_v2 = vmul.f32 %v1386_v21, %v2160_v13  ;;  %v1121_v18 = vmul.f32 %v1387_v22, %v2163_v3  ;;  %v1155_v46 = vsel %vm954_vm4, %v1037_v52, %v1050_v56 }
 0x22e   :  { %v1072_v39 = vadd.f32 %v1071_v24, %v1070_v53  ;;  %v1084_v30 = vrot.slane %v1083_v25, 4  ;;  %v1097_v19 = vrot.slane %v1096_v17, 4  ;;  %v1109_v57 = vadd.f32 %v1108_v29, %v1107_v59 }
 0x22f   :  { %v1063_v43 = vadd.f32 %v1062_v28, %v1061_v27  ;;  %v1122_v51 = vadd.f32 %v1121_v18, %v1120_v2  ;;  %v1725_v12 = vmov 0   ;;  %v1176_v36 = vpop.permute.xlu1 %1175  ;;  %v999_v31 = vlaneseq }
 0x230   :  { %v1073_v62 = vrot.slane %v1072_v39, 2  ;;  %v1085_v44 = vadd.f32 %v1084_v30, %v1083_v25  ;;  %v1098_v8 = vadd.f32 %v1097_v19, %v1096_v17  ;;  %v1110_v20 = vrot.slane %v1109_v57, 4  ;;  %1656 = vset.pattern.permute.xlu1 %v1725_v12  ;;  %1657 = vset.pattern.permute.xlu0 %v1725_v12 }
 0x231   :  { %v1156_v54 = vsel %vm956_vm5, %v1155_v46, %v1063_v43  ;;  %v1123_v55 = vrot.slane %v1122_v51, 4  ;;  %v1000_v42 = vand.u32 127, %v999_v31  ;;  %v1002_v24 = vshrl.u32 %v999_v31, 7 }
 0x232   :  { %v1074_v21 = vadd.f32 %v1073_v62, %v1072_v39  ;;  %v1086_v13 = vrot.slane %v1085_v44, 2  ;;  %v1099_v9 = vrot.slane %v1098_v8, 2  ;;  %v1111_v22 = vadd.f32 %v1110_v20, %v1109_v57 }
 0x233   :  { %v1124_v0 = vadd.f32 %v1123_v55, %v1122_v51  ;;  %v1003_v59 = vsub.s32 %v1000_v42, %v1002_v24 }
 0x234   :  { %v1075_v3 = vrot.slane %v1074_v21, 1  ;;  %v1087_v11 = vadd.f32 %v1086_v13, %v1085_v44  ;;  %v1100_v6 = vadd.f32 %v1099_v9, %v1098_v8  ;;  %v1112_v60 = vrot.slane %v1111_v22, 2 }
 0x235   :  { %v1125_v4 = vrot.slane %v1124_v0, 2 }
 0x236   :  { %v1076_v14 = vadd.f32 %v1075_v3, %v1074_v21  ;;  %v1088_v40 = vrot.slane %v1087_v11, 1  ;;  %v1101_v47 = vrot.slane %v1100_v6, 1  ;;  %v1113_v23 = vadd.f32 %v1112_v60, %v1111_v22 }
 0x237   :  { %v1126_v5 = vadd.f32 %v1125_v4, %v1124_v0 }
 0x238   :  { %v1089_v32 = vadd.f32 %v1088_v40, %v1087_v11  ;;  %v1157_v15 = vsel %vm958_vm6, %v1156_v54, %v1076_v14  ;;  %v1102_v35 = vadd.f32 %v1101_v47, %v1100_v6  ;;  %v1114_v58 = vrot.slane %v1113_v23, 1 }
 0x239   :  { %v1127_v26 = vrot.slane %v1126_v5, 1 }
 0x23a   :  { %v1158_v33 = vsel %vm960_vm8, %v1157_v15, %v1089_v32  ;;  %v1115_v34 = vadd.f32 %v1114_v58, %v1113_v23 }
 0x23b   :  { %v1159_v48 = vsel %vm962_vm9, %v1158_v33, %v1102_v35  ;;  %v1128_v7 = vadd.f32 %v1127_v26, %v1126_v5 }
 0x23c   :  { %v1160_v63 = vsel %vm964_vm7, %v1159_v48, %v1115_v34 }
 0x23d   :  { %v1161_v1 = vsel %vm281_vm3, %v1160_v63, %v1128_v7  ;;  %981 = vbcast.lane.b32.xlu0 %v1994_v16, 256 }
 0x23e   :  { %1164 = vadd.xlane.f32.xlu1 %v1161_v1 }
 0x24f   :  { %1179 = vbcast.lane.b32.xlu1 %v1994_v16, 264  ;;  %v1005_v16 = vadd.s32 4294967288, %v1000_v42 }
 0x251   :  { %v1008_v25 = vsub.s32 %v1005_v16, %v1002_v24 }
 0x2a2   :  { %v973_v10 = vpop.xlane.xlu0 %972 }
 0x2a3   :  { %v990_v37 = vadd.f32 %v986_v49, %v973_v10 }
 0x2a5   :  { %997 = vperm.xlu1 %1656, %v990_v37  }
 0x2b4   :  { %v971_v41 = vpop.xlane.xlu0 %970 }
 0x2b8   :  { %v982_v52 = vpop.permute.xlu0 %981 }
 0x2b9   :  { %v989_v53 = vadd.f32 %v982_v52, %v971_v41  ;;  %v1167_v38 = vpop.xlane.xlu1 %1166 }
 0x2bb   :  { %994 = vperm.xlu0 %1657, %v989_v53  }
 0x2cb   :  { %v1165_v45 = vpop.xlane.xlu1 %1164 }
 0x2cc   :  { %v1183_v50 = vadd.f32 %v1176_v36, %v1165_v45 }
 0x2ce   :  { %1188 = vperm.xlu1 %1656, %v1183_v50  }
 0x2cf   :  { %v1180_v61 = vpop.permute.xlu1 %1179 }
 0x2d0   :  { %v1184_v27 = vadd.f32 %v1180_v61, %v1167_v38 }
 0x2d2   :  { %1191 = vperm.xlu0 %1657, %v1184_v27  }
 0x324   :  { %v998_v56 = vpop.permute.xlu1 %997 }
 0x325   :  { %v1009_v17 = vrot.slane %v998_v56, %v1008_v25 }
 0x33a   :  { %v995_v28 = vpop.permute.xlu0 %994 }
 0x33b   :  { %v1004_v29 = vrot.slane %v995_v28, %v1003_v59 }
 0x33d   :  { %v1011_v39 = vsel %vm1010_vm10, %v1009_v17, %v1004_v29 }
 0x33e   :  { %1014 = vst.msk [vmem:[#allocation3] sm:$0x1] %vm1013_vm11, %v1011_v39 }
 0x34d   :  { %v1189_v30 = vpop.permute.xlu1 %1188 }
 0x34e   :  { %v1196_v18 = vrot.slane %v1189_v30, %v1003_v59 }
 0x351   :  { %v1192_v2 = vpop.permute.xlu0 %1191 }
 0x352   :  { %v1200_v43 = vrot.slane %v1192_v2, %v1008_v25 }
 0x354   :  { %v1201_v19 = vsel %vm1010_vm10, %v1200_v43, %v1196_v18 }
 0x355   :  { %1203 = vst.msk [vmem:[#allocation3 + $0x1] sm:$0x1] %vm1013_vm11, %v1201_v19 }
 0x356   :  { %1710 = shalt.err (!%p1707_p4)
}
 0x357   :  { %s1711_s12 = scalar_lea.hbm %s2259_s7, 32 }
 0x358   :  { %p1712_p5 = scmp.ne.s32.totalorder %s2259_s7, %s1711_s12  ;;  %p1715_p6 = scmp.lt.u32.totalorder %s1711_s12, %s2259_s7 }
 0x35a   :  { %p1717_p7 = pnand %p1715_p6, %p1712_p5 }
 0x35c   :  { %1720 = shalt.err (!%p1717_p7)
}
 0x35d   :  { %1213 = dma.vmem_to_hbm [thread:$0]  %s1211_s8, 32, %s2259_s7, [#allocation4]  }
 0x35e   :  { %1721 = dma.done.wait [#allocation4], 32  }
 0x35f   :  { %1722 = vsyncadd [#allocation4], 4294967264 }
 0x360   :  { %1217 = vsyncpa [#allocation4], 1 }

</bundles_post_ra>
